<compile_context>
chip_gen: v7x
topology: tpu7x:2x2x1
jax: 0.10.0
libtpu: 0.0.40
codegen_flags: <defaults>
</compile_context>

<pallas_src>
import jax
import jax.numpy as jnp
from jax.experimental import pallas as pl
from jax.experimental.pallas import tpu as pltpu

HIDDEN = 64
OUT_PAD = 128  # lane-dense classifier output (n_class padded to 128 lanes)


def _lstm_kernel(x_ref, wih0_ref, whh0_ref, b0_ref, w1_ref, b1_ref,
                 wcf_ref, bcf_ref, out_ref):
    T, B, D = x_ref.shape
    H = HIDDEN

    # Hoisted non-recurrent input projection for layer 0: one big matmul, bias folded in.
    xg = (jnp.dot(x_ref[...].reshape(T * B, D), wih0_ref[...],
                  preferred_element_type=jnp.float32)
          + b0_ref[...])                                   # (T*B, 4H)

    whh0 = whh0_ref[...]
    w1 = w1_ref[...]
    b1 = b1_ref[...]

    def activate(gates, c):
        # Gates arrive in (i, f, o | g) order: one sigmoid slab + one tanh slab.
        ifo = jax.nn.sigmoid(gates[:, :3 * H])
        g = jnp.tanh(gates[:, 3 * H:])
        i = ifo[:, 0 * H:1 * H]
        f = ifo[:, 1 * H:2 * H]
        o = ifo[:, 2 * H:3 * H]
        c_new = f * c + i * g
        h_new = o * jnp.tanh(c_new)
        return h_new, c_new

    h0 = jnp.zeros((B, H), jnp.float32)
    c0 = jnp.zeros((B, H), jnp.float32)
    h1 = jnp.zeros((B, H), jnp.float32)
    c1 = jnp.zeros((B, H), jnp.float32)

    # Static unroll over the (small) time dimension: per-step work is a single
    # recurrent dot per layer (layer 1's input+recurrent dots are fused, K = 2H = 128).
    for t in range(T):
        g0 = xg[t * B:(t + 1) * B, :] + jnp.dot(
            h0, whh0, preferred_element_type=jnp.float32)
        h0, c0 = activate(g0, c0)

        g1 = jnp.dot(jnp.concatenate([h0, h1], axis=1), w1,
                     preferred_element_type=jnp.float32) + b1
        h1, c1 = activate(g1, c1)

    # Fused classifier on the last timestep's layer-1 hidden state (lane-dense output).
    out_ref[...] = (jnp.dot(h1, wcf_ref[...],
                            preferred_element_type=jnp.float32)
                    + bcf_ref[...])


def _reorder_gates(w):
    """Reorder last-dim gate blocks from PyTorch (i, f, g, o) to (i, f, o, g)."""
    i, f, g, o = jnp.split(w, 4, axis=-1)
    return jnp.concatenate([i, f, o, g], axis=-1)


def rnn_forward(x, params):
    """x: (B, T, in_dim) float32 -> logits (B, n_class) float32."""
    wih0, whh0, b0, wih1, whh1, b1, wcf, bcf = params
    B, T, D = x.shape
    n_class = wcf.shape[1]
    H = HIDDEN

    # Repack weights: gate reorder, layer-1 input/recurrent fusion, lane-dense classifier.
    wih0_r = _reorder_gates(wih0)
    whh0_r = _reorder_gates(whh0)
    b0_r = _reorder_gates(b0)
    w1 = jnp.concatenate([_reorder_gates(wih1), _reorder_gates(whh1)], axis=0)  # (2H, 4H)
    b1_r = _reorder_gates(b1)
    wcf_p = jnp.pad(wcf, ((0, 0), (0, OUT_PAD - n_class)))
    bcf_p = jnp.pad(bcf, ((0, 0), (0, OUT_PAD - n_class)))

    # Time-major layout so each timestep's rows are a contiguous sublane block.
    x_tbd = jnp.transpose(x, (1, 0, 2))  # (T, B, D)

    def const_spec(shape):
        return pl.BlockSpec(shape, lambda i: tuple(0 for _ in shape))

    grid_spec = pltpu.PrefetchScalarGridSpec(
        num_scalar_prefetch=0,
        grid=(1,),  # single invocation: recurrence unrolled inside the kernel
        in_specs=[
            const_spec(x_tbd.shape),
            const_spec(wih0_r.shape),
            const_spec(whh0_r.shape),
            const_spec(b0_r.shape),
            const_spec(w1.shape),
            const_spec(b1_r.shape),
            const_spec(wcf_p.shape),
            const_spec(bcf_p.shape),
        ],
        out_specs=pl.BlockSpec((B, OUT_PAD), lambda i: (0, 0)),
    )

    out = pl.pallas_call(
        _lstm_kernel,
        out_shape=jax.ShapeDtypeStruct((B, OUT_PAD), jnp.float32),
        grid_spec=grid_spec,
        compiler_params=pltpu.CompilerParams(
            dimension_semantics=("arbitrary",)),
    )(x_tbd, wih0_r, whh0_r, b0_r, w1, b1_r, wcf_p, bcf_p)

    return out[:, :n_class]


def init_params(key, in_dim, n_class):
    """Deterministic init mimicking PyTorch LSTM/Linear defaults (uniform +-1/sqrt(H)).

    Weights are stored transposed as (in_features, 4H) / (H, n_class), gate order
    is PyTorch's (i, f, g, o); b = b_ih + b_hh (they are always summed in the cell).
    """
    keys = jax.random.split(key, 8)
    bound = 1.0 / jnp.sqrt(jnp.float32(HIDDEN))

    def u(k, shape):
        return jax.random.uniform(k, shape, jnp.float32, -bound, bound)

    wih0 = u(keys[0], (in_dim, 4 * HIDDEN))
    whh0 = u(keys[1], (HIDDEN, 4 * HIDDEN))
    b0 = u(keys[2], (1, 4 * HIDDEN)) + u(keys[3], (1, 4 * HIDDEN))
    wih1 = u(keys[4], (HIDDEN, 4 * HIDDEN))
    whh1 = u(keys[5], (HIDDEN, 4 * HIDDEN))
    b1 = u(keys[6], (1, 4 * HIDDEN)) + u(keys[7], (1, 4 * HIDDEN))
    kcf_w, kcf_b = jax.random.split(jax.random.fold_in(key, 123))
    wcf = jax.random.uniform(kcf_w, (HIDDEN, n_class), jnp.float32, -bound, bound)
    bcf = jax.random.uniform(kcf_b, (1, n_class), jnp.float32, -bound, bound)
    return (wih0, whh0, b0, wih1, whh1, b1, wcf, bcf)


def rnn_forward_ref(x, params):
    """Pure-JAX reference of the PyTorch forward pass (for correctness check)."""
    wih0, whh0, b0, wih1, whh1, b1, wcf, bcf = params
    B = x.shape[0]

    def cell(x_t, h, c, wih, whh, b):
        gates = x_t @ wih + h @ whh + b
        i = jax.nn.sigmoid(gates[:, 0 * HIDDEN:1 * HIDDEN])
        f = jax.nn.sigmoid(gates[:, 1 * HIDDEN:2 * HIDDEN])
        g = jnp.tanh(gates[:, 2 * HIDDEN:3 * HIDDEN])
        o = jax.nn.sigmoid(gates[:, 3 * HIDDEN:4 * HIDDEN])
        c_new = f * c + i * g
        h_new = o * jnp.tanh(c_new)
        return h_new, c_new

    def step(carry, x_t):
        h0, c0, h1, c1 = carry
        h0, c0 = cell(x_t, h0, c0, wih0, whh0, b0)
        h1, c1 = cell(h0, h1, c1, wih1, whh1, b1)
        return (h0, c0, h1, c1), None

    zeros = jnp.zeros((B, HIDDEN), jnp.float32)
    (h0, c0, h1, c1), _ = jax.lax.scan(step, (zeros,) * 4,
                                       jnp.transpose(x, (1, 0, 2)))
    return h1 @ wcf + bcf


if __name__ == "__main__":
    B, T, in_dim, n_class = 8, 8, 16, 10

    key = jax.random.PRNGKey(0)
    kx, kp = jax.random.split(key)
    x = jax.random.normal(kx, (B, T, in_dim), jnp.float32)
    params = init_params(kp, in_dim, n_class)

    out = jax.jit(rnn_forward)(x, params)
    out = jax.block_until_ready(out)

    ref = rnn_forward_ref(x, params)
    assert out.shape == (B, n_class), out.shape
    assert jnp.allclose(out, ref, atol=1e-4, rtol=1e-4), \
        f"max err {jnp.max(jnp.abs(out - ref))}"

    print("KERNEL_OK")
</pallas_src>

<mosaic_0001>
module attributes {stable_mosaic.version = 11 : i64} {
  func.func @_lstm_kernel(%arg0: i32, %arg1: memref<8x8x16xf32, #tpu.memory_space<vmem>>, %arg2: memref<16x256xf32, #tpu.memory_space<vmem>>, %arg3: memref<64x256xf32, #tpu.memory_space<vmem>>, %arg4: memref<1x256xf32, #tpu.memory_space<vmem>>, %arg5: memref<128x256xf32, #tpu.memory_space<vmem>>, %arg6: memref<1x256xf32, #tpu.memory_space<vmem>>, %arg7: memref<64x128xf32, #tpu.memory_space<vmem>>, %arg8: memref<1x128xf32, #tpu.memory_space<vmem>>, %arg9: memref<8x128xf32, #tpu.memory_space<vmem>>) attributes {dimension_semantics = [#tpu.dimension_semantics<arbitrary>], iteration_bounds = array<i64: 1>, scalar_prefetch = 0 : i64, scratch_operands = 0 : i64, tpu.core_type = #tpu.core_type<tc>, window_params = [{pipeline_mode = #tpu.pipeline_mode<synchronous>, transform_indices = @transform_0, window_bounds = array<i64: 8, 8, 16>}, {pipeline_mode = #tpu.pipeline_mode<synchronous>, transform_indices = @transform_1, window_bounds = array<i64: 16, 256>}, {pipeline_mode = #tpu.pipeline_mode<synchronous>, transform_indices = @transform_2, window_bounds = array<i64: 64, 256>}, {pipeline_mode = #tpu.pipeline_mode<synchronous>, transform_indices = @transform_3, window_bounds = array<i64: 1, 256>}, {pipeline_mode = #tpu.pipeline_mode<synchronous>, transform_indices = @transform_4, window_bounds = array<i64: 128, 256>}, {pipeline_mode = #tpu.pipeline_mode<synchronous>, transform_indices = @transform_5, window_bounds = array<i64: 1, 256>}, {pipeline_mode = #tpu.pipeline_mode<synchronous>, transform_indices = @transform_6, window_bounds = array<i64: 64, 128>}, {pipeline_mode = #tpu.pipeline_mode<synchronous>, transform_indices = @transform_7, window_bounds = array<i64: 1, 128>}, {pipeline_mode = #tpu.pipeline_mode<synchronous>, transform_indices = @transform_8, window_bounds = array<i64: 8, 128>}]} {
    %c0 = arith.constant 0 : index
    %c0_0 = arith.constant 0 : index
    %c0_1 = arith.constant 0 : index
    %0 = vector.load %arg1[%c0, %c0_0, %c0_1] : memref<8x8x16xf32, #tpu.memory_space<vmem>>, vector<8x8x16xf32>
    %1 = vector.shape_cast %0 : vector<8x8x16xf32> to vector<64x16xf32>
    %c0_2 = arith.constant 0 : index
    %c0_3 = arith.constant 0 : index
    %2 = vector.load %arg2[%c0_2, %c0_3] : memref<16x256xf32, #tpu.memory_space<vmem>>, vector<16x256xf32>
    %cst = arith.constant dense<0.000000e+00> : vector<64x256xf32>
    %3 = tpu.matmul %1, %2, %cst {dimension_numbers = #tpu.dot_dimension_numbers<[1], [0], [0], [1], [0, 0, 1, 1], [], []>} : vector<64x16xf32>, vector<16x256xf32>, vector<64x256xf32> -> vector<64x256xf32>
    %c0_4 = arith.constant 0 : index
    %c0_5 = arith.constant 0 : index
    %4 = vector.load %arg4[%c0_4, %c0_5] : memref<1x256xf32, #tpu.memory_space<vmem>>, vector<1x256xf32>
    %5 = vector.broadcast %4 : vector<1x256xf32> to vector<64x256xf32>
    %6 = arith.addf %3, %5 : vector<64x256xf32>
    %c0_6 = arith.constant 0 : index
    %c0_7 = arith.constant 0 : index
    %7 = vector.load %arg3[%c0_6, %c0_7] : memref<64x256xf32, #tpu.memory_space<vmem>>, vector<64x256xf32>
    %c0_8 = arith.constant 0 : index
    %c0_9 = arith.constant 0 : index
    %8 = vector.load %arg5[%c0_8, %c0_9] : memref<128x256xf32, #tpu.memory_space<vmem>>, vector<128x256xf32>
    %c0_10 = arith.constant 0 : index
    %c0_11 = arith.constant 0 : index
    %9 = vector.load %arg6[%c0_10, %c0_11] : memref<1x256xf32, #tpu.memory_space<vmem>>, vector<1x256xf32>
    %cst_12 = arith.constant 0.000000e+00 : f32
    %10 = vector.broadcast %cst_12 : f32 to vector<8x64xf32>
    %cst_13 = arith.constant 0.000000e+00 : f32
    %11 = vector.broadcast %cst_13 : f32 to vector<8x64xf32>
    %cst_14 = arith.constant 0.000000e+00 : f32
    %12 = vector.broadcast %cst_14 : f32 to vector<8x64xf32>
    %cst_15 = arith.constant 0.000000e+00 : f32
    %13 = vector.broadcast %cst_15 : f32 to vector<8x64xf32>
    %14 = vector.extract_strided_slice %6 {offsets = [0, 0], sizes = [8, 256], strides = [1, 1]} : vector<64x256xf32> to vector<8x256xf32>
    %cst_16 = arith.constant dense<0.000000e+00> : vector<8x256xf32>
    %15 = tpu.matmul %10, %7, %cst_16 {dimension_numbers = #tpu.dot_dimension_numbers<[1], [0], [0], [1], [0, 0, 1, 1], [], []>} : vector<8x64xf32>, vector<64x256xf32>, vector<8x256xf32> -> vector<8x256xf32>
    %16 = arith.addf %14, %15 : vector<8x256xf32>
    %17 = vector.extract_strided_slice %16 {offsets = [0, 0], sizes = [8, 192], strides = [1, 1]} : vector<8x256xf32> to vector<8x192xf32>
    %18 = arith.negf %17 : vector<8x192xf32>
    %19 = math.exp %18 : vector<8x192xf32>
    %cst_17 = arith.constant 1.000000e+00 : f32
    %20 = vector.broadcast %cst_17 : f32 to vector<8x192xf32>
    %21 = arith.addf %20, %19 : vector<8x192xf32>
    %22 = arith.divf %20, %21 : vector<8x192xf32>
    %23 = vector.extract_strided_slice %16 {offsets = [0, 192], sizes = [8, 64], strides = [1, 1]} : vector<8x256xf32> to vector<8x64xf32>
    %24 = math.tanh %23 : vector<8x64xf32>
    %25 = vector.extract_strided_slice %22 {offsets = [0, 0], sizes = [8, 64], strides = [1, 1]} : vector<8x192xf32> to vector<8x64xf32>
    %26 = vector.extract_strided_slice %22 {offsets = [0, 64], sizes = [8, 64], strides = [1, 1]} : vector<8x192xf32> to vector<8x64xf32>
    %27 = vector.extract_strided_slice %22 {offsets = [0, 128], sizes = [8, 64], strides = [1, 1]} : vector<8x192xf32> to vector<8x64xf32>
    %28 = arith.mulf %26, %11 : vector<8x64xf32>
    %29 = arith.mulf %25, %24 : vector<8x64xf32>
    %30 = arith.addf %28, %29 : vector<8x64xf32>
    %31 = math.tanh %30 : vector<8x64xf32>
    %32 = arith.mulf %27, %31 : vector<8x64xf32>
    %33 = tpu.concatenate %32, %12 in 1 : vector<8x64xf32>, vector<8x64xf32> -> vector<8x128xf32>
    %cst_18 = arith.constant dense<0.000000e+00> : vector<8x256xf32>
    %34 = tpu.matmul %33, %8, %cst_18 {dimension_numbers = #tpu.dot_dimension_numbers<[1], [0], [0], [1], [0, 0, 1, 1], [], []>} : vector<8x128xf32>, vector<128x256xf32>, vector<8x256xf32> -> vector<8x256xf32>
    %35 = vector.broadcast %9 : vector<1x256xf32> to vector<8x256xf32>
    %36 = arith.addf %34, %35 : vector<8x256xf32>
    %37 = vector.extract_strided_slice %36 {offsets = [0, 0], sizes = [8, 192], strides = [1, 1]} : vector<8x256xf32> to vector<8x192xf32>
    %38 = arith.negf %37 : vector<8x192xf32>
    %39 = math.exp %38 : vector<8x192xf32>
    %cst_19 = arith.constant 1.000000e+00 : f32
    %40 = vector.broadcast %cst_19 : f32 to vector<8x192xf32>
    %41 = arith.addf %40, %39 : vector<8x192xf32>
    %42 = arith.divf %40, %41 : vector<8x192xf32>
    %43 = vector.extract_strided_slice %36 {offsets = [0, 192], sizes = [8, 64], strides = [1, 1]} : vector<8x256xf32> to vector<8x64xf32>
    %44 = math.tanh %43 : vector<8x64xf32>
    %45 = vector.extract_strided_slice %42 {offsets = [0, 0], sizes = [8, 64], strides = [1, 1]} : vector<8x192xf32> to vector<8x64xf32>
    %46 = vector.extract_strided_slice %42 {offsets = [0, 64], sizes = [8, 64], strides = [1, 1]} : vector<8x192xf32> to vector<8x64xf32>
    %47 = vector.extract_strided_slice %42 {offsets = [0, 128], sizes = [8, 64], strides = [1, 1]} : vector<8x192xf32> to vector<8x64xf32>
    %48 = arith.mulf %46, %13 : vector<8x64xf32>
    %49 = arith.mulf %45, %44 : vector<8x64xf32>
    %50 = arith.addf %48, %49 : vector<8x64xf32>
    %51 = math.tanh %50 : vector<8x64xf32>
    %52 = arith.mulf %47, %51 : vector<8x64xf32>
    %53 = vector.extract_strided_slice %6 {offsets = [8, 0], sizes = [8, 256], strides = [1, 1]} : vector<64x256xf32> to vector<8x256xf32>
    %cst_20 = arith.constant dense<0.000000e+00> : vector<8x256xf32>
    %54 = tpu.matmul %32, %7, %cst_20 {dimension_numbers = #tpu.dot_dimension_numbers<[1], [0], [0], [1], [0, 0, 1, 1], [], []>} : vector<8x64xf32>, vector<64x256xf32>, vector<8x256xf32> -> vector<8x256xf32>
    %55 = arith.addf %53, %54 : vector<8x256xf32>
    %56 = vector.extract_strided_slice %55 {offsets = [0, 0], sizes = [8, 192], strides = [1, 1]} : vector<8x256xf32> to vector<8x192xf32>
    %57 = arith.negf %56 : vector<8x192xf32>
    %58 = math.exp %57 : vector<8x192xf32>
    %cst_21 = arith.constant 1.000000e+00 : f32
    %59 = vector.broadcast %cst_21 : f32 to vector<8x192xf32>
    %60 = arith.addf %59, %58 : vector<8x192xf32>
    %61 = arith.divf %59, %60 : vector<8x192xf32>
    %62 = vector.extract_strided_slice %55 {offsets = [0, 192], sizes = [8, 64], strides = [1, 1]} : vector<8x256xf32> to vector<8x64xf32>
    %63 = math.tanh %62 : vector<8x64xf32>
    %64 = vector.extract_strided_slice %61 {offsets = [0, 0], sizes = [8, 64], strides = [1, 1]} : vector<8x192xf32> to vector<8x64xf32>
    %65 = vector.extract_strided_slice %61 {offsets = [0, 64], sizes = [8, 64], strides = [1, 1]} : vector<8x192xf32> to vector<8x64xf32>
    %66 = vector.extract_strided_slice %61 {offsets = [0, 128], sizes = [8, 64], strides = [1, 1]} : vector<8x192xf32> to vector<8x64xf32>
    %67 = arith.mulf %65, %30 : vector<8x64xf32>
    %68 = arith.mulf %64, %63 : vector<8x64xf32>
    %69 = arith.addf %67, %68 : vector<8x64xf32>
    %70 = math.tanh %69 : vector<8x64xf32>
    %71 = arith.mulf %66, %70 : vector<8x64xf32>
    %72 = tpu.concatenate %71, %52 in 1 : vector<8x64xf32>, vector<8x64xf32> -> vector<8x128xf32>
    %cst_22 = arith.constant dense<0.000000e+00> : vector<8x256xf32>
    %73 = tpu.matmul %72, %8, %cst_22 {dimension_numbers = #tpu.dot_dimension_numbers<[1], [0], [0], [1], [0, 0, 1, 1], [], []>} : vector<8x128xf32>, vector<128x256xf32>, vector<8x256xf32> -> vector<8x256xf32>
    %74 = vector.broadcast %9 : vector<1x256xf32> to vector<8x256xf32>
    %75 = arith.addf %73, %74 : vector<8x256xf32>
    %76 = vector.extract_strided_slice %75 {offsets = [0, 0], sizes = [8, 192], strides = [1, 1]} : vector<8x256xf32> to vector<8x192xf32>
    %77 = arith.negf %76 : vector<8x192xf32>
    %78 = math.exp %77 : vector<8x192xf32>
    %cst_23 = arith.constant 1.000000e+00 : f32
    %79 = vector.broadcast %cst_23 : f32 to vector<8x192xf32>
    %80 = arith.addf %79, %78 : vector<8x192xf32>
    %81 = arith.divf %79, %80 : vector<8x192xf32>
    %82 = vector.extract_strided_slice %75 {offsets = [0, 192], sizes = [8, 64], strides = [1, 1]} : vector<8x256xf32> to vector<8x64xf32>
    %83 = math.tanh %82 : vector<8x64xf32>
    %84 = vector.extract_strided_slice %81 {offsets = [0, 0], sizes = [8, 64], strides = [1, 1]} : vector<8x192xf32> to vector<8x64xf32>
    %85 = vector.extract_strided_slice %81 {offsets = [0, 64], sizes = [8, 64], strides = [1, 1]} : vector<8x192xf32> to vector<8x64xf32>
    %86 = vector.extract_strided_slice %81 {offsets = [0, 128], sizes = [8, 64], strides = [1, 1]} : vector<8x192xf32> to vector<8x64xf32>
    %87 = arith.mulf %85, %50 : vector<8x64xf32>
    %88 = arith.mulf %84, %83 : vector<8x64xf32>
    %89 = arith.addf %87, %88 : vector<8x64xf32>
    %90 = math.tanh %89 : vector<8x64xf32>
    %91 = arith.mulf %86, %90 : vector<8x64xf32>
    %92 = vector.extract_strided_slice %6 {offsets = [16, 0], sizes = [8, 256], strides = [1, 1]} : vector<64x256xf32> to vector<8x256xf32>
    %cst_24 = arith.constant dense<0.000000e+00> : vector<8x256xf32>
    %93 = tpu.matmul %71, %7, %cst_24 {dimension_numbers = #tpu.dot_dimension_numbers<[1], [0], [0], [1], [0, 0, 1, 1], [], []>} : vector<8x64xf32>, vector<64x256xf32>, vector<8x256xf32> -> vector<8x256xf32>
    %94 = arith.addf %92, %93 : vector<8x256xf32>
    %95 = vector.extract_strided_slice %94 {offsets = [0, 0], sizes = [8, 192], strides = [1, 1]} : vector<8x256xf32> to vector<8x192xf32>
    %96 = arith.negf %95 : vector<8x192xf32>
    %97 = math.exp %96 : vector<8x192xf32>
    %cst_25 = arith.constant 1.000000e+00 : f32
    %98 = vector.broadcast %cst_25 : f32 to vector<8x192xf32>
    %99 = arith.addf %98, %97 : vector<8x192xf32>
    %100 = arith.divf %98, %99 : vector<8x192xf32>
    %101 = vector.extract_strided_slice %94 {offsets = [0, 192], sizes = [8, 64], strides = [1, 1]} : vector<8x256xf32> to vector<8x64xf32>
    %102 = math.tanh %101 : vector<8x64xf32>
    %103 = vector.extract_strided_slice %100 {offsets = [0, 0], sizes = [8, 64], strides = [1, 1]} : vector<8x192xf32> to vector<8x64xf32>
    %104 = vector.extract_strided_slice %100 {offsets = [0, 64], sizes = [8, 64], strides = [1, 1]} : vector<8x192xf32> to vector<8x64xf32>
    %105 = vector.extract_strided_slice %100 {offsets = [0, 128], sizes = [8, 64], strides = [1, 1]} : vector<8x192xf32> to vector<8x64xf32>
    %106 = arith.mulf %104, %69 : vector<8x64xf32>
    %107 = arith.mulf %103, %102 : vector<8x64xf32>
    %108 = arith.addf %106, %107 : vector<8x64xf32>
    %109 = math.tanh %108 : vector<8x64xf32>
    %110 = arith.mulf %105, %109 : vector<8x64xf32>
    %111 = tpu.concatenate %110, %91 in 1 : vector<8x64xf32>, vector<8x64xf32> -> vector<8x128xf32>
    %cst_26 = arith.constant dense<0.000000e+00> : vector<8x256xf32>
    %112 = tpu.matmul %111, %8, %cst_26 {dimension_numbers = #tpu.dot_dimension_numbers<[1], [0], [0], [1], [0, 0, 1, 1], [], []>} : vector<8x128xf32>, vector<128x256xf32>, vector<8x256xf32> -> vector<8x256xf32>
    %113 = vector.broadcast %9 : vector<1x256xf32> to vector<8x256xf32>
    %114 = arith.addf %112, %113 : vector<8x256xf32>
    %115 = vector.extract_strided_slice %114 {offsets = [0, 0], sizes = [8, 192], strides = [1, 1]} : vector<8x256xf32> to vector<8x192xf32>
    %116 = arith.negf %115 : vector<8x192xf32>
    %117 = math.exp %116 : vector<8x192xf32>
    %cst_27 = arith.constant 1.000000e+00 : f32
    %118 = vector.broadcast %cst_27 : f32 to vector<8x192xf32>
    %119 = arith.addf %118, %117 : vector<8x192xf32>
    %120 = arith.divf %118, %119 : vector<8x192xf32>
    %121 = vector.extract_strided_slice %114 {offsets = [0, 192], sizes = [8, 64], strides = [1, 1]} : vector<8x256xf32> to vector<8x64xf32>
    %122 = math.tanh %121 : vector<8x64xf32>
    %123 = vector.extract_strided_slice %120 {offsets = [0, 0], sizes = [8, 64], strides = [1, 1]} : vector<8x192xf32> to vector<8x64xf32>
    %124 = vector.extract_strided_slice %120 {offsets = [0, 64], sizes = [8, 64], strides = [1, 1]} : vector<8x192xf32> to vector<8x64xf32>
    %125 = vector.extract_strided_slice %120 {offsets = [0, 128], sizes = [8, 64], strides = [1, 1]} : vector<8x192xf32> to vector<8x64xf32>
    %126 = arith.mulf %124, %89 : vector<8x64xf32>
    %127 = arith.mulf %123, %122 : vector<8x64xf32>
    %128 = arith.addf %126, %127 : vector<8x64xf32>
    %129 = math.tanh %128 : vector<8x64xf32>
    %130 = arith.mulf %125, %129 : vector<8x64xf32>
    %131 = vector.extract_strided_slice %6 {offsets = [24, 0], sizes = [8, 256], strides = [1, 1]} : vector<64x256xf32> to vector<8x256xf32>
    %cst_28 = arith.constant dense<0.000000e+00> : vector<8x256xf32>
    %132 = tpu.matmul %110, %7, %cst_28 {dimension_numbers = #tpu.dot_dimension_numbers<[1], [0], [0], [1], [0, 0, 1, 1], [], []>} : vector<8x64xf32>, vector<64x256xf32>, vector<8x256xf32> -> vector<8x256xf32>
    %133 = arith.addf %131, %132 : vector<8x256xf32>
    %134 = vector.extract_strided_slice %133 {offsets = [0, 0], sizes = [8, 192], strides = [1, 1]} : vector<8x256xf32> to vector<8x192xf32>
    %135 = arith.negf %134 : vector<8x192xf32>
    %136 = math.exp %135 : vector<8x192xf32>
    %cst_29 = arith.constant 1.000000e+00 : f32
    %137 = vector.broadcast %cst_29 : f32 to vector<8x192xf32>
    %138 = arith.addf %137, %136 : vector<8x192xf32>
    %139 = arith.divf %137, %138 : vector<8x192xf32>
    %140 = vector.extract_strided_slice %133 {offsets = [0, 192], sizes = [8, 64], strides = [1, 1]} : vector<8x256xf32> to vector<8x64xf32>
    %141 = math.tanh %140 : vector<8x64xf32>
    %142 = vector.extract_strided_slice %139 {offsets = [0, 0], sizes = [8, 64], strides = [1, 1]} : vector<8x192xf32> to vector<8x64xf32>
    %143 = vector.extract_strided_slice %139 {offsets = [0, 64], sizes = [8, 64], strides = [1, 1]} : vector<8x192xf32> to vector<8x64xf32>
    %144 = vector.extract_strided_slice %139 {offsets = [0, 128], sizes = [8, 64], strides = [1, 1]} : vector<8x192xf32> to vector<8x64xf32>
    %145 = arith.mulf %143, %108 : vector<8x64xf32>
    %146 = arith.mulf %142, %141 : vector<8x64xf32>
    %147 = arith.addf %145, %146 : vector<8x64xf32>
    %148 = math.tanh %147 : vector<8x64xf32>
    %149 = arith.mulf %144, %148 : vector<8x64xf32>
    %150 = tpu.concatenate %149, %130 in 1 : vector<8x64xf32>, vector<8x64xf32> -> vector<8x128xf32>
    %cst_30 = arith.constant dense<0.000000e+00> : vector<8x256xf32>
    %151 = tpu.matmul %150, %8, %cst_30 {dimension_numbers = #tpu.dot_dimension_numbers<[1], [0], [0], [1], [0, 0, 1, 1], [], []>} : vector<8x128xf32>, vector<128x256xf32>, vector<8x256xf32> -> vector<8x256xf32>
    %152 = vector.broadcast %9 : vector<1x256xf32> to vector<8x256xf32>
    %153 = arith.addf %151, %152 : vector<8x256xf32>
    %154 = vector.extract_strided_slice %153 {offsets = [0, 0], sizes = [8, 192], strides = [1, 1]} : vector<8x256xf32> to vector<8x192xf32>
    %155 = arith.negf %154 : vector<8x192xf32>
    %156 = math.exp %155 : vector<8x192xf32>
    %cst_31 = arith.constant 1.000000e+00 : f32
    %157 = vector.broadcast %cst_31 : f32 to vector<8x192xf32>
    %158 = arith.addf %157, %156 : vector<8x192xf32>
    %159 = arith.divf %157, %158 : vector<8x192xf32>
    %160 = vector.extract_strided_slice %153 {offsets = [0, 192], sizes = [8, 64], strides = [1, 1]} : vector<8x256xf32> to vector<8x64xf32>
    %161 = math.tanh %160 : vector<8x64xf32>
    %162 = vector.extract_strided_slice %159 {offsets = [0, 0], sizes = [8, 64], strides = [1, 1]} : vector<8x192xf32> to vector<8x64xf32>
    %163 = vector.extract_strided_slice %159 {offsets = [0, 64], sizes = [8, 64], strides = [1, 1]} : vector<8x192xf32> to vector<8x64xf32>
    %164 = vector.extract_strided_slice %159 {offsets = [0, 128], sizes = [8, 64], strides = [1, 1]} : vector<8x192xf32> to vector<8x64xf32>
    %165 = arith.mulf %163, %128 : vector<8x64xf32>
    %166 = arith.mulf %162, %161 : vector<8x64xf32>
    %167 = arith.addf %165, %166 : vector<8x64xf32>
    %168 = math.tanh %167 : vector<8x64xf32>
    %169 = arith.mulf %164, %168 : vector<8x64xf32>
    %170 = vector.extract_strided_slice %6 {offsets = [32, 0], sizes = [8, 256], strides = [1, 1]} : vector<64x256xf32> to vector<8x256xf32>
    %cst_32 = arith.constant dense<0.000000e+00> : vector<8x256xf32>
    %171 = tpu.matmul %149, %7, %cst_32 {dimension_numbers = #tpu.dot_dimension_numbers<[1], [0], [0], [1], [0, 0, 1, 1], [], []>} : vector<8x64xf32>, vector<64x256xf32>, vector<8x256xf32> -> vector<8x256xf32>
    %172 = arith.addf %170, %171 : vector<8x256xf32>
    %173 = vector.extract_strided_slice %172 {offsets = [0, 0], sizes = [8, 192], strides = [1, 1]} : vector<8x256xf32> to vector<8x192xf32>
    %174 = arith.negf %173 : vector<8x192xf32>
    %175 = math.exp %174 : vector<8x192xf32>
    %cst_33 = arith.constant 1.000000e+00 : f32
    %176 = vector.broadcast %cst_33 : f32 to vector<8x192xf32>
    %177 = arith.addf %176, %175 : vector<8x192xf32>
    %178 = arith.divf %176, %177 : vector<8x192xf32>
    %179 = vector.extract_strided_slice %172 {offsets = [0, 192], sizes = [8, 64], strides = [1, 1]} : vector<8x256xf32> to vector<8x64xf32>
    %180 = math.tanh %179 : vector<8x64xf32>
    %181 = vector.extract_strided_slice %178 {offsets = [0, 0], sizes = [8, 64], strides = [1, 1]} : vector<8x192xf32> to vector<8x64xf32>
    %182 = vector.extract_strided_slice %178 {offsets = [0, 64], sizes = [8, 64], strides = [1, 1]} : vector<8x192xf32> to vector<8x64xf32>
    %183 = vector.extract_strided_slice %178 {offsets = [0, 128], sizes = [8, 64], strides = [1, 1]} : vector<8x192xf32> to vector<8x64xf32>
    %184 = arith.mulf %182, %147 : vector<8x64xf32>
    %185 = arith.mulf %181, %180 : vector<8x64xf32>
    %186 = arith.addf %184, %185 : vector<8x64xf32>
    %187 = math.tanh %186 : vector<8x64xf32>
    %188 = arith.mulf %183, %187 : vector<8x64xf32>
    %189 = tpu.concatenate %188, %169 in 1 : vector<8x64xf32>, vector<8x64xf32> -> vector<8x128xf32>
    %cst_34 = arith.constant dense<0.000000e+00> : vector<8x256xf32>
    %190 = tpu.matmul %189, %8, %cst_34 {dimension_numbers = #tpu.dot_dimension_numbers<[1], [0], [0], [1], [0, 0, 1, 1], [], []>} : vector<8x128xf32>, vector<128x256xf32>, vector<8x256xf32> -> vector<8x256xf32>
    %191 = vector.broadcast %9 : vector<1x256xf32> to vector<8x256xf32>
    %192 = arith.addf %190, %191 : vector<8x256xf32>
    %193 = vector.extract_strided_slice %192 {offsets = [0, 0], sizes = [8, 192], strides = [1, 1]} : vector<8x256xf32> to vector<8x192xf32>
    %194 = arith.negf %193 : vector<8x192xf32>
    %195 = math.exp %194 : vector<8x192xf32>
    %cst_35 = arith.constant 1.000000e+00 : f32
    %196 = vector.broadcast %cst_35 : f32 to vector<8x192xf32>
    %197 = arith.addf %196, %195 : vector<8x192xf32>
    %198 = arith.divf %196, %197 : vector<8x192xf32>
    %199 = vector.extract_strided_slice %192 {offsets = [0, 192], sizes = [8, 64], strides = [1, 1]} : vector<8x256xf32> to vector<8x64xf32>
    %200 = math.tanh %199 : vector<8x64xf32>
    %201 = vector.extract_strided_slice %198 {offsets = [0, 0], sizes = [8, 64], strides = [1, 1]} : vector<8x192xf32> to vector<8x64xf32>
    %202 = vector.extract_strided_slice %198 {offsets = [0, 64], sizes = [8, 64], strides = [1, 1]} : vector<8x192xf32> to vector<8x64xf32>
    %203 = vector.extract_strided_slice %198 {offsets = [0, 128], sizes = [8, 64], strides = [1, 1]} : vector<8x192xf32> to vector<8x64xf32>
    %204 = arith.mulf %202, %167 : vector<8x64xf32>
    %205 = arith.mulf %201, %200 : vector<8x64xf32>
    %206 = arith.addf %204, %205 : vector<8x64xf32>
    %207 = math.tanh %206 : vector<8x64xf32>
    %208 = arith.mulf %203, %207 : vector<8x64xf32>
    %209 = vector.extract_strided_slice %6 {offsets = [40, 0], sizes = [8, 256], strides = [1, 1]} : vector<64x256xf32> to vector<8x256xf32>
    %cst_36 = arith.constant dense<0.000000e+00> : vector<8x256xf32>
    %210 = tpu.matmul %188, %7, %cst_36 {dimension_numbers = #tpu.dot_dimension_numbers<[1], [0], [0], [1], [0, 0, 1, 1], [], []>} : vector<8x64xf32>, vector<64x256xf32>, vector<8x256xf32> -> vector<8x256xf32>
    %211 = arith.addf %209, %210 : vector<8x256xf32>
    %212 = vector.extract_strided_slice %211 {offsets = [0, 0], sizes = [8, 192], strides = [1, 1]} : vector<8x256xf32> to vector<8x192xf32>
    %213 = arith.negf %212 : vector<8x192xf32>
    %214 = math.exp %213 : vector<8x192xf32>
    %cst_37 = arith.constant 1.000000e+00 : f32
    %215 = vector.broadcast %cst_37 : f32 to vector<8x192xf32>
    %216 = arith.addf %215, %214 : vector<8x192xf32>
    %217 = arith.divf %215, %216 : vector<8x192xf32>
    %218 = vector.extract_strided_slice %211 {offsets = [0, 192], sizes = [8, 64], strides = [1, 1]} : vector<8x256xf32> to vector<8x64xf32>
    %219 = math.tanh %218 : vector<8x64xf32>
    %220 = vector.extract_strided_slice %217 {offsets = [0, 0], sizes = [8, 64], strides = [1, 1]} : vector<8x192xf32> to vector<8x64xf32>
    %221 = vector.extract_strided_slice %217 {offsets = [0, 64], sizes = [8, 64], strides = [1, 1]} : vector<8x192xf32> to vector<8x64xf32>
    %222 = vector.extract_strided_slice %217 {offsets = [0, 128], sizes = [8, 64], strides = [1, 1]} : vector<8x192xf32> to vector<8x64xf32>
    %223 = arith.mulf %221, %186 : vector<8x64xf32>
    %224 = arith.mulf %220, %219 : vector<8x64xf32>
    %225 = arith.addf %223, %224 : vector<8x64xf32>
    %226 = math.tanh %225 : vector<8x64xf32>
    %227 = arith.mulf %222, %226 : vector<8x64xf32>
    %228 = tpu.concatenate %227, %208 in 1 : vector<8x64xf32>, vector<8x64xf32> -> vector<8x128xf32>
    %cst_38 = arith.constant dense<0.000000e+00> : vector<8x256xf32>
    %229 = tpu.matmul %228, %8, %cst_38 {dimension_numbers = #tpu.dot_dimension_numbers<[1], [0], [0], [1], [0, 0, 1, 1], [], []>} : vector<8x128xf32>, vector<128x256xf32>, vector<8x256xf32> -> vector<8x256xf32>
    %230 = vector.broadcast %9 : vector<1x256xf32> to vector<8x256xf32>
    %231 = arith.addf %229, %230 : vector<8x256xf32>
    %232 = vector.extract_strided_slice %231 {offsets = [0, 0], sizes = [8, 192], strides = [1, 1]} : vector<8x256xf32> to vector<8x192xf32>
    %233 = arith.negf %232 : vector<8x192xf32>
    %234 = math.exp %233 : vector<8x192xf32>
    %cst_39 = arith.constant 1.000000e+00 : f32
    %235 = vector.broadcast %cst_39 : f32 to vector<8x192xf32>
    %236 = arith.addf %235, %234 : vector<8x192xf32>
    %237 = arith.divf %235, %236 : vector<8x192xf32>
    %238 = vector.extract_strided_slice %231 {offsets = [0, 192], sizes = [8, 64], strides = [1, 1]} : vector<8x256xf32> to vector<8x64xf32>
    %239 = math.tanh %238 : vector<8x64xf32>
    %240 = vector.extract_strided_slice %237 {offsets = [0, 0], sizes = [8, 64], strides = [1, 1]} : vector<8x192xf32> to vector<8x64xf32>
    %241 = vector.extract_strided_slice %237 {offsets = [0, 64], sizes = [8, 64], strides = [1, 1]} : vector<8x192xf32> to vector<8x64xf32>
    %242 = vector.extract_strided_slice %237 {offsets = [0, 128], sizes = [8, 64], strides = [1, 1]} : vector<8x192xf32> to vector<8x64xf32>
    %243 = arith.mulf %241, %206 : vector<8x64xf32>
    %244 = arith.mulf %240, %239 : vector<8x64xf32>
    %245 = arith.addf %243, %244 : vector<8x64xf32>
    %246 = math.tanh %245 : vector<8x64xf32>
    %247 = arith.mulf %242, %246 : vector<8x64xf32>
    %248 = vector.extract_strided_slice %6 {offsets = [48, 0], sizes = [8, 256], strides = [1, 1]} : vector<64x256xf32> to vector<8x256xf32>
    %cst_40 = arith.constant dense<0.000000e+00> : vector<8x256xf32>
    %249 = tpu.matmul %227, %7, %cst_40 {dimension_numbers = #tpu.dot_dimension_numbers<[1], [0], [0], [1], [0, 0, 1, 1], [], []>} : vector<8x64xf32>, vector<64x256xf32>, vector<8x256xf32> -> vector<8x256xf32>
    %250 = arith.addf %248, %249 : vector<8x256xf32>
    %251 = vector.extract_strided_slice %250 {offsets = [0, 0], sizes = [8, 192], strides = [1, 1]} : vector<8x256xf32> to vector<8x192xf32>
    %252 = arith.negf %251 : vector<8x192xf32>
    %253 = math.exp %252 : vector<8x192xf32>
    %cst_41 = arith.constant 1.000000e+00 : f32
    %254 = vector.broadcast %cst_41 : f32 to vector<8x192xf32>
    %255 = arith.addf %254, %253 : vector<8x192xf32>
    %256 = arith.divf %254, %255 : vector<8x192xf32>
    %257 = vector.extract_strided_slice %250 {offsets = [0, 192], sizes = [8, 64], strides = [1, 1]} : vector<8x256xf32> to vector<8x64xf32>
    %258 = math.tanh %257 : vector<8x64xf32>
    %259 = vector.extract_strided_slice %256 {offsets = [0, 0], sizes = [8, 64], strides = [1, 1]} : vector<8x192xf32> to vector<8x64xf32>
    %260 = vector.extract_strided_slice %256 {offsets = [0, 64], sizes = [8, 64], strides = [1, 1]} : vector<8x192xf32> to vector<8x64xf32>
    %261 = vector.extract_strided_slice %256 {offsets = [0, 128], sizes = [8, 64], strides = [1, 1]} : vector<8x192xf32> to vector<8x64xf32>
    %262 = arith.mulf %260, %225 : vector<8x64xf32>
    %263 = arith.mulf %259, %258 : vector<8x64xf32>
    %264 = arith.addf %262, %263 : vector<8x64xf32>
    %265 = math.tanh %264 : vector<8x64xf32>
    %266 = arith.mulf %261, %265 : vector<8x64xf32>
    %267 = tpu.concatenate %266, %247 in 1 : vector<8x64xf32>, vector<8x64xf32> -> vector<8x128xf32>
    %cst_42 = arith.constant dense<0.000000e+00> : vector<8x256xf32>
    %268 = tpu.matmul %267, %8, %cst_42 {dimension_numbers = #tpu.dot_dimension_numbers<[1], [0], [0], [1], [0, 0, 1, 1], [], []>} : vector<8x128xf32>, vector<128x256xf32>, vector<8x256xf32> -> vector<8x256xf32>
    %269 = vector.broadcast %9 : vector<1x256xf32> to vector<8x256xf32>
    %270 = arith.addf %268, %269 : vector<8x256xf32>
    %271 = vector.extract_strided_slice %270 {offsets = [0, 0], sizes = [8, 192], strides = [1, 1]} : vector<8x256xf32> to vector<8x192xf32>
    %272 = arith.negf %271 : vector<8x192xf32>
    %273 = math.exp %272 : vector<8x192xf32>
    %cst_43 = arith.constant 1.000000e+00 : f32
    %274 = vector.broadcast %cst_43 : f32 to vector<8x192xf32>
    %275 = arith.addf %274, %273 : vector<8x192xf32>
    %276 = arith.divf %274, %275 : vector<8x192xf32>
    %277 = vector.extract_strided_slice %270 {offsets = [0, 192], sizes = [8, 64], strides = [1, 1]} : vector<8x256xf32> to vector<8x64xf32>
    %278 = math.tanh %277 : vector<8x64xf32>
    %279 = vector.extract_strided_slice %276 {offsets = [0, 0], sizes = [8, 64], strides = [1, 1]} : vector<8x192xf32> to vector<8x64xf32>
    %280 = vector.extract_strided_slice %276 {offsets = [0, 64], sizes = [8, 64], strides = [1, 1]} : vector<8x192xf32> to vector<8x64xf32>
    %281 = vector.extract_strided_slice %276 {offsets = [0, 128], sizes = [8, 64], strides = [1, 1]} : vector<8x192xf32> to vector<8x64xf32>
    %282 = arith.mulf %280, %245 : vector<8x64xf32>
    %283 = arith.mulf %279, %278 : vector<8x64xf32>
    %284 = arith.addf %282, %283 : vector<8x64xf32>
    %285 = math.tanh %284 : vector<8x64xf32>
    %286 = arith.mulf %281, %285 : vector<8x64xf32>
    %287 = vector.extract_strided_slice %6 {offsets = [56, 0], sizes = [8, 256], strides = [1, 1]} : vector<64x256xf32> to vector<8x256xf32>
    %cst_44 = arith.constant dense<0.000000e+00> : vector<8x256xf32>
    %288 = tpu.matmul %266, %7, %cst_44 {dimension_numbers = #tpu.dot_dimension_numbers<[1], [0], [0], [1], [0, 0, 1, 1], [], []>} : vector<8x64xf32>, vector<64x256xf32>, vector<8x256xf32> -> vector<8x256xf32>
    %289 = arith.addf %287, %288 : vector<8x256xf32>
    %290 = vector.extract_strided_slice %289 {offsets = [0, 0], sizes = [8, 192], strides = [1, 1]} : vector<8x256xf32> to vector<8x192xf32>
    %291 = arith.negf %290 : vector<8x192xf32>
    %292 = math.exp %291 : vector<8x192xf32>
    %cst_45 = arith.constant 1.000000e+00 : f32
    %293 = vector.broadcast %cst_45 : f32 to vector<8x192xf32>
    %294 = arith.addf %293, %292 : vector<8x192xf32>
    %295 = arith.divf %293, %294 : vector<8x192xf32>
    %296 = vector.extract_strided_slice %289 {offsets = [0, 192], sizes = [8, 64], strides = [1, 1]} : vector<8x256xf32> to vector<8x64xf32>
    %297 = math.tanh %296 : vector<8x64xf32>
    %298 = vector.extract_strided_slice %295 {offsets = [0, 0], sizes = [8, 64], strides = [1, 1]} : vector<8x192xf32> to vector<8x64xf32>
    %299 = vector.extract_strided_slice %295 {offsets = [0, 64], sizes = [8, 64], strides = [1, 1]} : vector<8x192xf32> to vector<8x64xf32>
    %300 = vector.extract_strided_slice %295 {offsets = [0, 128], sizes = [8, 64], strides = [1, 1]} : vector<8x192xf32> to vector<8x64xf32>
    %301 = arith.mulf %299, %264 : vector<8x64xf32>
    %302 = arith.mulf %298, %297 : vector<8x64xf32>
    %303 = arith.addf %301, %302 : vector<8x64xf32>
    %304 = math.tanh %303 : vector<8x64xf32>
    %305 = arith.mulf %300, %304 : vector<8x64xf32>
    %306 = tpu.concatenate %305, %286 in 1 : vector<8x64xf32>, vector<8x64xf32> -> vector<8x128xf32>
    %cst_46 = arith.constant dense<0.000000e+00> : vector<8x256xf32>
    %307 = tpu.matmul %306, %8, %cst_46 {dimension_numbers = #tpu.dot_dimension_numbers<[1], [0], [0], [1], [0, 0, 1, 1], [], []>} : vector<8x128xf32>, vector<128x256xf32>, vector<8x256xf32> -> vector<8x256xf32>
    %308 = vector.broadcast %9 : vector<1x256xf32> to vector<8x256xf32>
    %309 = arith.addf %307, %308 : vector<8x256xf32>
    %310 = vector.extract_strided_slice %309 {offsets = [0, 0], sizes = [8, 192], strides = [1, 1]} : vector<8x256xf32> to vector<8x192xf32>
    %311 = arith.negf %310 : vector<8x192xf32>
    %312 = math.exp %311 : vector<8x192xf32>
    %cst_47 = arith.constant 1.000000e+00 : f32
    %313 = vector.broadcast %cst_47 : f32 to vector<8x192xf32>
    %314 = arith.addf %313, %312 : vector<8x192xf32>
    %315 = arith.divf %313, %314 : vector<8x192xf32>
    %316 = vector.extract_strided_slice %309 {offsets = [0, 192], sizes = [8, 64], strides = [1, 1]} : vector<8x256xf32> to vector<8x64xf32>
    %317 = math.tanh %316 : vector<8x64xf32>
    %318 = vector.extract_strided_slice %315 {offsets = [0, 0], sizes = [8, 64], strides = [1, 1]} : vector<8x192xf32> to vector<8x64xf32>
    %319 = vector.extract_strided_slice %315 {offsets = [0, 64], sizes = [8, 64], strides = [1, 1]} : vector<8x192xf32> to vector<8x64xf32>
    %320 = vector.extract_strided_slice %315 {offsets = [0, 128], sizes = [8, 64], strides = [1, 1]} : vector<8x192xf32> to vector<8x64xf32>
    %321 = arith.mulf %319, %284 : vector<8x64xf32>
    %322 = arith.mulf %318, %317 : vector<8x64xf32>
    %323 = arith.addf %321, %322 : vector<8x64xf32>
    %324 = math.tanh %323 : vector<8x64xf32>
    %325 = arith.mulf %320, %324 : vector<8x64xf32>
    %c0_48 = arith.constant 0 : index
    %c0_49 = arith.constant 0 : index
    %326 = vector.load %arg7[%c0_48, %c0_49] : memref<64x128xf32, #tpu.memory_space<vmem>>, vector<64x128xf32>
    %cst_50 = arith.constant dense<0.000000e+00> : vector<8x128xf32>
    %327 = tpu.matmul %325, %326, %cst_50 {dimension_numbers = #tpu.dot_dimension_numbers<[1], [0], [0], [1], [0, 0, 1, 1], [], []>} : vector<8x64xf32>, vector<64x128xf32>, vector<8x128xf32> -> vector<8x128xf32>
    %c0_51 = arith.constant 0 : index
    %c0_52 = arith.constant 0 : index
    %328 = vector.load %arg8[%c0_51, %c0_52] : memref<1x128xf32, #tpu.memory_space<vmem>>, vector<1x128xf32>
    %329 = vector.broadcast %328 : vector<1x128xf32> to vector<8x128xf32>
    %330 = arith.addf %327, %329 : vector<8x128xf32>
    %c0_53 = arith.constant 0 : index
    %c0_54 = arith.constant 0 : index
    %331 = vector.load %arg9[%c0_53, %c0_54] : memref<8x128xf32, #tpu.memory_space<vmem>>, vector<8x128xf32>
    tpu.vector_store %arg9[%c0_53, %c0_54], %330 {strides = array<i32>} : memref<8x128xf32, #tpu.memory_space<vmem>>, vector<8x128xf32>,
    return
  }
  func.func @transform_0(%arg0: i32) -> (i32, i32, i32) {
    %c0_i32 = arith.constant 0 : i32
    %c0_i32_0 = arith.constant 0 : i32
    %c0_i32_1 = arith.constant 0 : i32
    %c0_i32_2 = arith.constant 0 : i32
    return %c0_i32, %c0_i32_0, %c0_i32_1 : i32, i32, i32
  }
  func.func @transform_1(%arg0: i32) -> (i32, i32) {
    %c0_i32 = arith.constant 0 : i32
    %c0_i32_0 = arith.constant 0 : i32
    %c0_i32_1 = arith.constant 0 : i32
    return %c0_i32, %c0_i32_0 : i32, i32
  }
  func.func @transform_2(%arg0: i32) -> (i32, i32) {
    %c0_i32 = arith.constant 0 : i32
    %c0_i32_0 = arith.constant 0 : i32
    %c0_i32_1 = arith.constant 0 : i32
    return %c0_i32, %c0_i32_0 : i32, i32
  }
  func.func @transform_3(%arg0: i32) -> (i32, i32) {
    %c0_i32 = arith.constant 0 : i32
    %c0_i32_0 = arith.constant 0 : i32
    %c0_i32_1 = arith.constant 0 : i32
    return %c0_i32, %c0_i32_0 : i32, i32
  }
  func.func @transform_4(%arg0: i32) -> (i32, i32) {
    %c0_i32 = arith.constant 0 : i32
    %c0_i32_0 = arith.constant 0 : i32
    %c0_i32_1 = arith.constant 0 : i32
    return %c0_i32, %c0_i32_0 : i32, i32
  }
  func.func @transform_5(%arg0: i32) -> (i32, i32) {
    %c0_i32 = arith.constant 0 : i32
    %c0_i32_0 = arith.constant 0 : i32
    %c0_i32_1 = arith.constant 0 : i32
    return %c0_i32, %c0_i32_0 : i32, i32
  }
  func.func @transform_6(%arg0: i32) -> (i32, i32) {
    %c0_i32 = arith.constant 0 : i32
    %c0_i32_0 = arith.constant 0 : i32
    %c0_i32_1 = arith.constant 0 : i32
    return %c0_i32, %c0_i32_0 : i32, i32
  }
  func.func @transform_7(%arg0: i32) -> (i32, i32) {
    %c0_i32 = arith.constant 0 : i32
    %c0_i32_0 = arith.constant 0 : i32
    %c0_i32_1 = arith.constant 0 : i32
    return %c0_i32, %c0_i32_0 : i32, i32
  }
  func.func @transform_8(%arg0: i32) -> (i32, i32) {
    %c0_i32 = arith.constant 0 : i32
    %c0_i32_0 = arith.constant 0 : i32
    %c0_i32_1 = arith.constant 0 : i32
    return %c0_i32, %c0_i32_0 : i32, i32
  }
}

</mosaic_0001>

<bundles_post_ra>
// kernel: rnn_forward.1
= control target key start
LH: loop header
LB: loop body
LE: loop exit
PB: predicated region body
PF: predicated region fallthrough
CT: control target
= control target key end

     0   :  { %v2779_v5 = vmov 0.0   ;;  %vm54_vm0 = vcmask 130048   ;;  %s3511_s0 = inlined_call_operand.vmem [shape: f32[8,8,16], index: 0, kind: input, shape index: {}]   ;;  %s3512_s1 = inlined_call_operand.vmem [shape: f32[16,256], index: 1, kind: input, shape index: {}]   ;;  %s3513_s2 = inlined_call_operand.vmem [shape: f32[64,256], index: 2, kind: input, shape index: {}]   ;;  %s3514_s3 = inlined_call_operand.vmem [shape: f32[1,256], index: 3, kind: input, shape index: {}]   ;;  %s3515_s4 = inlined_call_operand.vmem [shape: f32[128,256], index: 4, kind: input, shape index: {}]   ;;  %s3516_s5 = inlined_call_operand.vmem [shape: f32[1,256], index: 5, kind: input, shape index: {}]   ;;  %s3517_s6 = inlined_call_operand.vmem [shape: f32[64,128], index: 6, kind: input, shape index: {}]   ;;  %s3518_s7 = inlined_call_operand.vmem [shape: f32[1,128], index: 7, kind: input, shape index: {}]   ;;  %s3519_s8 = inlined_call_operand.hbm [shape: f32[8,128], index: 8, kind: output, shape index: {}]  }
   0x1   :  { %v39_v0 = vld [vmem:[%s3512_s1 + $0x8] sm:$0xff]  ;;  %v41_v1 = vld [vmem:[%s3512_s1 + $0x18] sm:$0xff]  ;;  %v38_v2 = vld [vmem:[%s3512_s1] sm:$0xff]  ;;  %143 = vmatprep.mubr.f32.mxu0 %v2779_v5  ;;  %424 = vmatprep.mubr.f32.mxu1 %v2779_v5 }
   0x2   :  { %v2126_v3 = vpack.c.bf16 %v41_v1, %v39_v0  ;;  %v40_v4 = vld [vmem:[%s3512_s1 + $0x10] sm:$0xff]  ;;  %v193_v6 = vld [vmem:[%s3513_s2 + $0x8] sm:$0xff]  ;;  %v195_v8 = vld [vmem:[%s3513_s2 + $0x18] sm:$0xff] }
   0x3   :  { %v2128_v7 = vpack.c.bf16 %v40_v4, %v38_v2  ;;  %v192_v9 = vld [vmem:[%s3513_s2] sm:$0xff]  ;;  %v194_v10 = vld [vmem:[%s3513_s2 + $0x10] sm:$0xff]  ;;  %v2855_v11 = vpack.c.bf16 %v195_v8, %v193_v6  ;;  %v197_v12 = vld [vmem:[%s3513_s2 + $0x28] sm:$0xff] }
   0x4   :  { %2127 = vmatprep.subr.bf16.mxu0 %v2126_v3  ;;  %v30_v13 = vld [vmem:[%s3511_s0] sm:$0xff]  ;;  %v2863_v14 = vpack.c.bf16 %v194_v10, %v192_v9  ;;  %v199_v15 = vld [vmem:[%s3513_s2 + $0x38] sm:$0xff]  ;;  %v198_v18 = vld [vmem:[%s3513_s2 + $0x30] sm:$0xff] }
   0x5   :  { %2129 = vmatpush1.bf16.msra.mxu0 %v2128_v7  ;;  %v2869_v16 = vpack.c.bf16 %v199_v15, %v197_v12  ;;  %v196_v17 = vld [vmem:[%s3513_s2 + $0x20] sm:$0xff]  ;;  %v201_v19 = vld [vmem:[%s3513_s2 + $0x48] sm:$0xff]  ;;  %v203_v20 = vld [vmem:[%s3513_s2 + $0x58] sm:$0xff] }
   0x6   :  { %2131 = vmatprep.subr.bf16.mxu0 %v2855_v11  ;;  %v31_v21 = vld [vmem:[%s3511_s0 + $0x8] sm:$0xff]  ;;  %v2889_v22 = vpack.c.bf16 %v198_v18, %v196_v17  ;;  %v2892_v23 = vpack.c.bf16 %v203_v20, %v201_v19  ;;  %v200_v24 = vld [vmem:[%s3513_s2 + $0x40] sm:$0xff]  ;;  %v202_v25 = vld [vmem:[%s3513_s2 + $0x50] sm:$0xff] }
   0x8   :  { %2048 = vmatmul.mubr.msk.f32.vlgmr.msra.gmra.mrb[0].mxu0 %vm54_vm0, %v30_v13 }
   0x9   :  { %2133 = vmatpush1.bf16.msra.mxu0 %v2863_v14  ;;  %149 = vmatprep.mubr.f32.mxu0 %v2779_v5 }
   0xa   :  { %2135 = vmatprep.subr.bf16.mxu0 %v2869_v16 }
   0xb   :  { %13 = vsyncpa [#allocation3], 0  ;;  %v205_v26 = vld [vmem:[%s3513_s2 + $0x68] sm:$0xff]  ;;  %v207_v27 = vld [vmem:[%s3513_s2 + $0x78] sm:$0xff]  ;;  %v2912_v29 = vpack.c.bf16 %v202_v25, %v200_v24  ;;  %v44_v39 = vlaneseq  ;;  %s2780_s15 = smov 64   ;;  %vm241_vm1 = vcmask 523264  }
   0xc   :  { %2049 = vmatmul.mubr.msk.f32.gmra.mrb[2].mxu0 %vm54_vm0, %v31_v21  ;;  %v32_v28 = vld [vmem:[%s3511_s0 + $0x10] sm:$0xff]  ;;  %v2915_v30 = vpack.c.bf16 %v207_v27, %v205_v26  ;;  %v204_v31 = vld [vmem:[%s3513_s2 + $0x60] sm:$0xff]  ;;  %v33_v33 = vld [vmem:[%s3511_s0 + $0x18] sm:$0xff]  ;;  %vm2782_vm2 = vmmov 0   ;;  %s2783_s20 = smov [#allocation2]  }
   0xd   :  { %155 = vmatprep.mubr.f32.mxu0 %v2779_v5  ;;  %2137 = vmatpush1.bf16.msra.mxu0 %v2889_v22  ;;  %v206_v32 = vld [vmem:[%s3513_s2 + $0x70] sm:$0xff]  ;;  %v34_v35 = vld [vmem:[%s3511_s0 + $0x20] sm:$0xff]  ;;  %v35_v36 = vld [vmem:[%s3511_s0 + $0x28] sm:$0xff]  ;;  %v2966_v40 = vshrl.u32 %v44_v39, 7  ;;  %s2040_s21 = sshll.u32 %s2783_s20, 4  ;;  %s2041_s21 = int_to_ptr.vmem [resolvable:$true] %s2040_s21 }
   0xe   :  { %2139 = vmatprep.subr.bf16.mxu0 %v2892_v23  ;;  %v2929_v34 = vpack.c.bf16 %v206_v32, %v204_v31  ;;  %v36_v37 = vld [vmem:[%s3511_s0 + $0x30] sm:$0xff]  ;;  %v37_v38 = vld [vmem:[%s3511_s0 + $0x38] sm:$0xff]  ;;  %v42_v42 = vld [vmem:[%s3514_s3] sm:$0x3]  ;;  %p2760_p1 = scmp.lt.s32.totalorder %s2041_s21, %s2041_s21 }
   0xf   :  { %v50_v41 = vsub.s32 1, %v2966_v40  ;;  %v46_v48 = vsub.s32 0, %v2966_v40  ;;  %v209_v57 = vld [vmem:[%s3515_s4 + $0x8] sm:$0xff]  ;;  %v211_v58 = vld [vmem:[%s3515_s4 + $0x18] sm:$0xff]  ;;  %v208_v59 = vld [vmem:[%s3515_s4] sm:$0xff] }
  0x10   :  { %2050 = vmatmul.mubr.msk.f32.gmra.mrb[4].mxu0 %vm54_vm0, %v32_v28  ;;  %v3000_v60 = vpack.c.bf16 %v211_v58, %v209_v57  ;;  %v210_v61 = vld [vmem:[%s3515_s4 + $0x10] sm:$0xff]  ;;  %v213_v62 = vld [vmem:[%s3515_s4 + $0x28] sm:$0xff]  ;;  %v215_v63 = vld [vmem:[%s3515_s4 + $0x38] sm:$0xff] }
  0x11   :  { %161 = vmatprep.mubr.f32.mxu0 %v2779_v5  ;;  %2141 = vmatpush1.bf16.msra.mxu0 %v2912_v29  ;;  %v2974_v43 = vrot.slane %v42_v42, %v50_v41  ;;  %v2984_v49 = vrot.slane %v42_v42, %v46_v48  ;;  %v3011_v0 = vpack.c.bf16 %v210_v61, %v208_v59  ;;  %v212_v2 = vld [vmem:[%s3515_s4 + $0x20] sm:$0xff]  ;;  %v214_v3 = vld [vmem:[%s3515_s4 + $0x30] sm:$0xff]  ;;  %v217_v4 = vld [vmem:[%s3515_s4 + $0x48] sm:$0xff] }
  0x12   :  { %2143 = vmatprep.subr.bf16.mxu0 %v2915_v30  ;;  %v3013_v1 = vpack.c.bf16 %v215_v63, %v213_v62  ;;  %2147 = vmatprep.subr.bf16.mxu1 %v3000_v60  ;;  %v219_v6 = vld [vmem:[%s3515_s4 + $0x58] sm:$0xff]  ;;  %v3029_v7 = vpack.c.bf16 %v214_v3, %v212_v2  ;;  %v216_v9 = vld [vmem:[%s3515_s4 + $0x40] sm:$0xff]  ;;  %v218_v10 = vld [vmem:[%s3515_s4 + $0x50] sm:$0xff] }
  0x13   :  { %2149 = vmatpush1.bf16.msra.mxu1 %v3011_v0  ;;  %v3032_v8 = vpack.c.bf16 %v219_v6, %v217_v4  ;;  %v221_v12 = vld [vmem:[%s3515_s4 + $0x68] sm:$0xff]  ;;  %v223_v13 = vld [vmem:[%s3515_s4 + $0x78] sm:$0xff]  ;;  %v3047_v15 = vpack.c.bf16 %v218_v10, %v216_v9  ;;  %v220_v18 = vld [vmem:[%s3515_s4 + $0x60] sm:$0xff] }
  0x14   :  { %2051 = vmatmul.mubr.msk.f32.gmra.mrb[6].mxu0 %vm54_vm0, %v33_v33  ;;  %2151 = vmatprep.subr.bf16.mxu1 %v3013_v1  ;;  %v3050_v17 = vpack.c.bf16 %v223_v13, %v221_v12  ;;  %v222_v19 = vld [vmem:[%s3515_s4 + $0x70] sm:$0xff]  ;;  %v225_v20 = vld [vmem:[%s3515_s4 + $0x88] sm:$0xff]  ;;  %v227_v21 = vld [vmem:[%s3515_s4 + $0x98] sm:$0xff] }
  0x15   :  { %167 = vmatprep.mubr.f32.mxu0 %v2779_v5  ;;  %2145 = vmatpush1.bf16.msra.mxu0 %v2929_v34  ;;  %v3065_v24 = vpack.c.bf16 %v222_v19, %v220_v18  ;;  %v3068_v25 = vpack.c.bf16 %v227_v21, %v225_v20  ;;  %v224_v26 = vld [vmem:[%s3515_s4 + $0x80] sm:$0xff]  ;;  %v226_v27 = vld [vmem:[%s3515_s4 + $0x90] sm:$0xff]  ;;  %v229_v28 = vld [vmem:[%s3515_s4 + $0xa8] sm:$0xff] }
  0x16   :  { %2179 = vmatprep.subr.bf16.mxu0 %v2855_v11  ;;  %v231_v31 = vld [vmem:[%s3515_s4 + $0xb8] sm:$0xff]  ;;  %v3083_v32 = vpack.c.bf16 %v226_v27, %v224_v26 }
  0x17   :  { %2153 = vmatpush1.bf16.msra.mxu1 %v3029_v7  ;;  %v3086_v33 = vpack.c.bf16 %v231_v31, %v229_v28 }
  0x18   :  { %2052 = vmatmul.mubr.msk.f32.gmra.mrb[8].mxu0 %vm54_vm0, %v34_v35  ;;  %2155 = vmatprep.subr.bf16.mxu1 %v3032_v8  ;;  %v228_v35 = vld [vmem:[%s3515_s4 + $0xa0] sm:$0xff] }
  0x19   :  { %173 = vmatprep.mubr.f32.mxu0 %v2779_v5 }
  0x1b   :  { %2157 = vmatpush1.bf16.msra.mxu1 %v3047_v15 }
  0x1c   :  { %2053 = vmatmul.mubr.msk.f32.gmra.mrb[10].mxu0 %vm54_vm0, %v35_v36  ;;  %2159 = vmatprep.subr.bf16.mxu1 %v3050_v17  ;;  %v230_v36 = vld [vmem:[%s3515_s4 + $0xb0] sm:$0xff] }
  0x1d   :  { %179 = vmatprep.mubr.f32.mxu0 %v2779_v5  ;;  %v3101_v39 = vpack.c.bf16 %v230_v36, %v228_v35 }
  0x1f   :  { %2161 = vmatpush1.bf16.msra.mxu1 %v3065_v24 }
  0x20   :  { %2054 = vmatmul.mubr.msk.f32.gmra.mrb[12].mxu0 %vm54_vm0, %v36_v37  ;;  %2163 = vmatprep.subr.bf16.mxu1 %v3068_v25  ;;  %v233_v37 = vld [vmem:[%s3515_s4 + $0xc8] sm:$0xff] }
  0x21   :  { %185 = vmatprep.mubr.f32.mxu0 %v2779_v5 }
  0x23   :  { %2165 = vmatpush1.bf16.msra.mxu1 %v3083_v32 }
  0x24   :  { %2055 = vmatmul.mubr.msk.f32.gmra.mrb[14].mxu0 %vm54_vm0, %v37_v38  ;;  %v235_v38 = vld [vmem:[%s3515_s4 + $0xd8] sm:$0xff]  ;;  %2167 = vmatprep.subr.bf16.mxu1 %v3086_v33 }
  0x25   :  { %309 = vmatprep.mubr.f32.mxu0 %v2779_v5  ;;  %v3104_v42 = vpack.c.bf16 %v235_v38, %v233_v37 }
  0x27   :  { %2169 = vmatpush1.bf16.msra.mxu1 %v3101_v39 }
  0x28   :  { %310 = vmatmul.mubr.f32.vlgmr.msra.gmra.mrb[0].mxu0 %v2779_v5  ;;  %2171 = vmatprep.subr.bf16.mxu1 %v3104_v42 }
  0x29   :  { %2181 = vmatpush1.bf16.msra.mxu0 %v2863_v14  ;;  %528 = vmatprep.mubr.f32.mxu0 %v2779_v5 }
  0x2a   :  { %2183 = vmatprep.subr.bf16.mxu0 %v2869_v16 }
  0x2d   :  { %2185 = vmatpush1.bf16.msra.mxu0 %v2889_v22 }
  0x2e   :  { %2187 = vmatprep.subr.bf16.mxu0 %v2892_v23 }
  0x31   :  { %2189 = vmatpush1.bf16.msra.mxu0 %v2912_v29 }
  0x32   :  { %2191 = vmatprep.subr.bf16.mxu0 %v2915_v30 }
  0x35   :  { %2193 = vmatpush1.bf16.msra.mxu0 %v2929_v34 }
  0x36   :  { %2227 = vmatprep.subr.bf16.mxu0 %v2855_v11 }
  0xfb   :  { %v311_v44 = vpop.f32.mrb[0].mxu0 }
  0xfc   :  { %v313_v45 = vpop.f32.mrb[1].mxu0  ;;  %v2526_v50 = vadd.f32 %v311_v44, %v2984_v49  ;;  %v232_v44 = vld [vmem:[%s3515_s4 + $0xc0] sm:$0xff] }
  0xfd   :  { %v2977_v46 = vadd.f32 %v313_v45, %v2974_v43  ;;  %v234_v45 = vld [vmem:[%s3515_s4 + $0xd0] sm:$0xff] }
  0xfe   :  { %v2056_v51 = vmul.f32 -1.442695, %v2526_v50  ;;  %v239_v50 = vld [vmem:[%s3515_s4 + $0xf8] sm:$0xff] }
  0xff   :  { %2563 = vtanh.f32 %v2977_v46  ;;  %v2057_v62 = vmul.f32 -1.442695, %v2977_v46  ;;  %v240_v46 = vld [vmem:[%s3516_s5] sm:$0x3] }
 0x100   :  { %2565 = vpow2.f32 %v2056_v51  ;;  %v3119_v51 = vpack.c.bf16 %v234_v45, %v232_v44 }
 0x102   :  { %2173 = vmatpush1.bf16.msra.mxu1 %v3119_v51 }
 0x109   :  { %v2564_v47 = vpop.eup %2563 }
 0x10a   :  { %333 = vrot.lane.b32.xlu0 %v2564_v47, %s2780_s15  ;;  %v2566_v52 = vpop.eup %2565  ;;  %v237_v47 = vld [vmem:[%s3515_s4 + $0xe8] sm:$0xff] }
 0x10b   :  { %v324_v53 = vadd.f32 1.0, %v2566_v52  ;;  %v3122_v52 = vpack.c.bf16 %v239_v50, %v237_v47 }
 0x10d   :  { %2567 = vrcp.f32 %v324_v53  ;;  %v236_v53 = vld [vmem:[%s3515_s4 + $0xe0] sm:$0xff]  ;;  %2175 = vmatprep.subr.bf16.mxu1 %v3122_v52 }
 0x117   :  { %v2987_v54 = vpop.eup %2567 }
 0x118   :  { %v331_v57 = vmul.f32 0.0, %v2987_v54 }
 0x17c   :  { %v334_v55 = vpop.permute.xlu0 %333 }
 0x17d   :  { %v336_v56 = vmul.f32 %v2987_v54, %v334_v55  ;;  %v238_v55 = vld [vmem:[%s3515_s4 + $0xf0] sm:$0xff]  ;;  %v3175_v54 = vrot.slane %v240_v46, %v50_v41  ;;  %v3183_v41 = vrot.slane %v240_v46, %v46_v48 }
 0x17f   :  { %338 = vrot.lane.b32.xlu0 %v336_v56, %s2780_s15  ;;  %v3131_v56 = vpack.c.bf16 %v238_v55, %v236_v53 }
 0x181   :  { %2177 = vmatpush1.bf16.msra.mxu1 %v3131_v56 }
 0x182   :  { %2195 = vmatprep.subr.bf16.mxu1 %v3000_v60 }
 0x1f1   :  { %v339_v58 = vpop.permute.xlu0 %338 }
 0x1f2   :  { %v3137_v59 = vadd.f32 %v339_v58, %v331_v57 }
 0x1f4   :  { %2569 = vtanh.f32 %v3137_v59 }
 0x1f5   :  { %2571 = vpow2.f32 %v2057_v62 }
 0x1fe   :  { %v2570_v61 = vpop.eup %2569 }
 0x1ff   :  { %344 = vrot.lane.b32.xlu1 %v2570_v61, %s2780_s15  ;;  %v2572_v63 = vpop.eup %2571 }
 0x200   :  { %v325_v2 = vadd.f32 1.0, %v2572_v63 }
 0x202   :  { %2573 = vrcp.f32 %v325_v2 }
 0x20c   :  { %v2574_v3 = vpop.eup %2573 }
 0x271   :  { %v345_v4 = vpop.permute.xlu1 %344 }
 0x272   :  { %v347_v6 = vmul.f32 %v2574_v3, %v345_v4 }
 0x274   :  { %2058 = vmatmul.mubr.msk.f32.vlgmr.msra.gmra.mrb[0].mxu1 %vm241_vm1, %v347_v6  ;;  %2061 = vmatmul.mubr.msk.f32.vlgmr.msra.gmra.mrb[2].mxu0 %vm241_vm1, %v347_v6 }
 0x275   :  { %2229 = vmatpush1.bf16.msra.mxu0 %v2863_v14  ;;  %740 = vmatprep.mubr.f32.mxu0 %v2779_v5 }
 0x276   :  { %2231 = vmatprep.subr.bf16.mxu0 %v2869_v16  ;;  %2197 = vmatpush1.bf16.msra.mxu1 %v3011_v0 }
 0x277   :  { %2199 = vmatprep.subr.bf16.mxu1 %v3013_v1  ;;  %636 = vmatprep.mubr.f32.mxu1 %v2779_v5 }
 0x279   :  { %2233 = vmatpush1.bf16.msra.mxu0 %v2889_v22 }
 0x27a   :  { %2235 = vmatprep.subr.bf16.mxu0 %v2892_v23  ;;  %2201 = vmatpush1.bf16.msra.mxu1 %v3029_v7 }
 0x27b   :  { %2203 = vmatprep.subr.bf16.mxu1 %v3032_v8 }
 0x27d   :  { %2237 = vmatpush1.bf16.msra.mxu0 %v2912_v29 }
 0x27e   :  { %2239 = vmatprep.subr.bf16.mxu0 %v2915_v30  ;;  %2205 = vmatpush1.bf16.msra.mxu1 %v3047_v15 }
 0x27f   :  { %2207 = vmatprep.subr.bf16.mxu1 %v3050_v17 }
 0x281   :  { %2241 = vmatpush1.bf16.msra.mxu0 %v2929_v34 }
 0x282   :  { %2209 = vmatpush1.bf16.msra.mxu1 %v3065_v24  ;;  %2275 = vmatprep.subr.bf16.mxu0 %v2855_v11 }
 0x283   :  { %2211 = vmatprep.subr.bf16.mxu1 %v3068_v25 }
 0x286   :  { %2213 = vmatpush1.bf16.msra.mxu1 %v3083_v32 }
 0x287   :  { %2215 = vmatprep.subr.bf16.mxu1 %v3086_v33 }
 0x28a   :  { %2217 = vmatpush1.bf16.msra.mxu1 %v3101_v39 }
 0x28b   :  { %2219 = vmatprep.subr.bf16.mxu1 %v3104_v42 }
 0x28e   :  { %2221 = vmatpush1.bf16.msra.mxu1 %v3119_v51 }
 0x28f   :  { %2223 = vmatprep.subr.bf16.mxu1 %v3122_v52 }
 0x292   :  { %2225 = vmatpush1.bf16.msra.mxu1 %v3131_v56 }
 0x293   :  { %2243 = vmatprep.subr.bf16.mxu1 %v3000_v60 }
 0x347   :  { %v426_v9 = vpop.f32.mrb[0].mxu1  ;;  %v530_v10 = vpop.f32.mrb[2].mxu0 }
 0x348   :  { %v428_v12 = vpop.f32.mrb[1].mxu1  ;;  %v532_v13 = vpop.f32.mrb[3].mxu0  ;;  %v427_v26 = vadd.f32 %v426_v9, %v3183_v41  ;;  %v2528_v28 = vadd.f32 %v530_v10, %v2984_v49 }
 0x349   :  { %v429_v18 = vadd.f32 %v428_v12, %v3175_v54  ;;  %v2529_v19 = vadd.f32 %v532_v13, %v2974_v43 }
 0x34a   :  { %v2059_v27 = vmul.f32 -1.442695, %v427_v26  ;;  %v2062_v31 = vmul.f32 -1.442695, %v2528_v28 }
 0x34b   :  { %2575 = vtanh.f32 %v429_v18  ;;  %v2060_v3 = vmul.f32 -1.442695, %v429_v18  ;;  %v2063_v4 = vmul.f32 -1.442695, %v2529_v19 }
 0x34c   :  { %2577 = vtanh.f32 %v2529_v19 }
 0x34d   :  { %2579 = vpow2.f32 %v2059_v27 }
 0x34e   :  { %2581 = vpow2.f32 %v2062_v31 }
 0x355   :  { %v2576_v20 = vpop.eup %2575 }
 0x356   :  { %446 = vrot.lane.b32.xlu1 %v2576_v20, %s2780_s15  ;;  %v2578_v21 = vpop.eup %2577 }
 0x357   :  { %552 = vrot.lane.b32.xlu0 %v2578_v21, %s2780_s15  ;;  %v2580_v35 = vpop.eup %2579 }
 0x358   :  { %v437_v36 = vadd.f32 1.0, %v2580_v35  ;;  %v2582_v37 = vpop.eup %2581 }
 0x359   :  { %v543_v38 = vadd.f32 1.0, %v2582_v37 }
 0x35a   :  { %2583 = vrcp.f32 %v437_v36 }
 0x35b   :  { %2585 = vrcp.f32 %v543_v38 }
 0x364   :  { %v2584_v44 = vpop.eup %2583 }
 0x365   :  { %v2586_v40 = vpop.eup %2585  ;;  %v444_v53 = vmul.f32 0.0, %v2584_v44 }
 0x366   :  { %v550_v58 = vmul.f32 %v2586_v40, %v3137_v59 }
 0x3c8   :  { %v447_v45 = vpop.permute.xlu1 %446 }
 0x3c9   :  { %v449_v47 = vmul.f32 %v2584_v44, %v447_v45  ;;  %v553_v48 = vpop.permute.xlu0 %552 }
 0x3ca   :  { %v555_v50 = vmul.f32 %v2586_v40, %v553_v48 }
 0x3cb   :  { %451 = vrot.lane.b32.xlu1 %v449_v47, %s2780_s15 }
 0x3cc   :  { %557 = vrot.lane.b32.xlu0 %v555_v50, %s2780_s15 }
 0x43d   :  { %v452_v55 = vpop.permute.xlu1 %451 }
 0x43e   :  { %v3189_v57 = vadd.f32 %v452_v55, %v444_v53  ;;  %v558_v61 = vpop.permute.xlu0 %557 }
 0x43f   :  { %v3193_v62 = vadd.f32 %v558_v61, %v550_v58 }
 0x440   :  { %2587 = vtanh.f32 %v3189_v57 }
 0x441   :  { %2589 = vtanh.f32 %v3193_v62 }
 0x442   :  { %2591 = vpow2.f32 %v2060_v3 }
 0x443   :  { %2593 = vpow2.f32 %v2063_v4 }
 0x44a   :  { %v2588_v63 = vpop.eup %2587 }
 0x44b   :  { %457 = vrot.lane.b32.xlu1 %v2588_v63, %s2780_s15  ;;  %v2590_v2 = vpop.eup %2589 }
 0x44c   :  { %563 = vrot.lane.b32.xlu0 %v2590_v2, %s2780_s15  ;;  %v2592_v6 = vpop.eup %2591 }
 0x44d   :  { %v438_v46 = vadd.f32 1.0, %v2592_v6  ;;  %v2594_v9 = vpop.eup %2593 }
 0x44e   :  { %v544_v59 = vadd.f32 1.0, %v2594_v9 }
 0x44f   :  { %2595 = vrcp.f32 %v438_v46 }
 0x450   :  { %2597 = vrcp.f32 %v544_v59 }
 0x459   :  { %v2596_v10 = vpop.eup %2595 }
 0x45a   :  { %v2598_v20 = vpop.eup %2597 }
 0x4bd   :  { %v458_v12 = vpop.permute.xlu1 %457 }
 0x4be   :  { %v460_v13 = vmul.f32 %v2596_v10, %v458_v12  ;;  %v564_v21 = vpop.permute.xlu0 %563 }
 0x4bf   :  { %v566_v26 = vmul.f32 %v2598_v20, %v564_v21 }
 0x4c0   :  { %568 = vrot.lane.b32.xlu1 %v460_v13, %s2780_s15 }
 0x4c1   :  { %2066 = vmatmul.mubr.msk.f32.vlgmr.msra.gmra.mrb[4].mxu0 %vm241_vm1, %v566_v26 }
 0x4c2   :  { %2277 = vmatpush1.bf16.msra.mxu0 %v2863_v14  ;;  %952 = vmatprep.mubr.f32.mxu0 %v2779_v5 }
 0x4c3   :  { %2279 = vmatprep.subr.bf16.mxu0 %v2869_v16 }
 0x4c6   :  { %2281 = vmatpush1.bf16.msra.mxu0 %v2889_v22 }
 0x4c7   :  { %2283 = vmatprep.subr.bf16.mxu0 %v2892_v23 }
 0x4ca   :  { %2285 = vmatpush1.bf16.msra.mxu0 %v2912_v29 }
 0x4cb   :  { %2287 = vmatprep.subr.bf16.mxu0 %v2915_v30 }
 0x4ce   :  { %2289 = vmatpush1.bf16.msra.mxu0 %v2929_v34 }
 0x4cf   :  { %2291 = vmatprep.subr.bf16.mxu0 %v3000_v60 }
 0x532   :  { %v569_v18 = vpop.permute.xlu1 %568 }
 0x533   :  { %v571_v19 = vsel %vm241_vm1, %v566_v26, %v569_v18 }
 0x534   :  { %637 = vmatmul.mubr.f32.vlgmr.msra.gmra.mrb[2].mxu1 %v571_v19 }
 0x535   :  { %2245 = vmatpush1.bf16.msra.mxu1 %v3011_v0  ;;  %848 = vmatprep.mubr.f32.mxu1 %v2779_v5 }
 0x536   :  { %2247 = vmatprep.subr.bf16.mxu1 %v3013_v1 }
 0x539   :  { %2249 = vmatpush1.bf16.msra.mxu1 %v3029_v7 }
 0x53a   :  { %2251 = vmatprep.subr.bf16.mxu1 %v3032_v8 }
 0x53d   :  { %2253 = vmatpush1.bf16.msra.mxu1 %v3047_v15 }
 0x53e   :  { %2255 = vmatprep.subr.bf16.mxu1 %v3050_v17 }
 0x541   :  { %2257 = vmatpush1.bf16.msra.mxu1 %v3065_v24 }
 0x542   :  { %2259 = vmatprep.subr.bf16.mxu1 %v3068_v25 }
 0x545   :  { %2261 = vmatpush1.bf16.msra.mxu1 %v3083_v32 }
 0x546   :  { %2263 = vmatprep.subr.bf16.mxu1 %v3086_v33 }
 0x549   :  { %2265 = vmatpush1.bf16.msra.mxu1 %v3101_v39 }
 0x54a   :  { %2267 = vmatprep.subr.bf16.mxu1 %v3104_v42 }
 0x54d   :  { %2269 = vmatpush1.bf16.msra.mxu1 %v3119_v51 }
 0x54e   :  { %2271 = vmatprep.subr.bf16.mxu1 %v3122_v52 }
 0x551   :  { %2273 = vmatpush1.bf16.msra.mxu1 %v3131_v56 }
 0x552   :  { %2339 = vmatprep.subr.bf16.mxu1 %v3000_v60 }
 0x594   :  { %v742_v27 = vpop.f32.mrb[4].mxu0 }
 0x595   :  { %v744_v28 = vpop.f32.mrb[5].mxu0  ;;  %v2530_v36 = vadd.f32 %v742_v27, %v2984_v49 }
 0x596   :  { %v2531_v31 = vadd.f32 %v744_v28, %v2974_v43 }
 0x597   :  { %v2067_v37 = vmul.f32 -1.442695, %v2530_v36 }
 0x598   :  { %2599 = vtanh.f32 %v2531_v31  ;;  %v2068_v12 = vmul.f32 -1.442695, %v2531_v31 }
 0x599   :  { %2601 = vpow2.f32 %v2067_v37 }
 0x5a2   :  { %v2600_v35 = vpop.eup %2599 }
 0x5a3   :  { %764 = vrot.lane.b32.xlu1 %v2600_v35, %s2780_s15  ;;  %v2602_v44 = vpop.eup %2601 }
 0x5a4   :  { %v755_v40 = vadd.f32 1.0, %v2602_v44 }
 0x607   :  { %v638_v38 = vpop.f32.mrb[2].mxu1 }
 0x608   :  { %v640_v45 = vpop.f32.mrb[3].mxu1  ;;  %v639_v58 = vadd.f32 %v638_v38, %v3183_v41 }
 0x609   :  { %v641_v47 = vadd.f32 %v640_v45, %v3175_v54 }
 0x60a   :  { %v2064_v61 = vmul.f32 -1.442695, %v639_v58 }
 0x60b   :  { %2603 = vtanh.f32 %v641_v47 }
 0x60c   :  { %2605 = vrcp.f32 %v755_v40 }
 0x60d   :  { %2607 = vpow2.f32 %v2064_v61 }
 0x615   :  { %v2604_v48 = vpop.eup %2603  ;;  %v765_v53 = vpop.permute.xlu1 %764 }
 0x616   :  { %658 = vrot.lane.b32.xlu0 %v2604_v48, %s2780_s15  ;;  %v2606_v50 = vpop.eup %2605 }
 0x617   :  { %v767_v55 = vmul.f32 %v2606_v50, %v765_v53  ;;  %v2608_v63 = vpop.eup %2607  ;;  %v762_v46 = vmul.f32 %v2606_v50, %v3193_v62 }
 0x618   :  { %v649_v2 = vadd.f32 1.0, %v2608_v63 }
 0x619   :  { %769 = vrot.lane.b32.xlu1 %v767_v55, %s2780_s15 }
 0x61a   :  { %2609 = vrcp.f32 %v649_v2 }
 0x624   :  { %v2610_v3 = vpop.eup %2609 }
 0x625   :  { %v656_v13 = vmul.f32 %v2610_v3, %v3189_v57  ;;  %v2065_v57 = vmul.f32 -1.442695, %v641_v47 }
 0x688   :  { %v659_v4 = vpop.permute.xlu0 %658 }
 0x689   :  { %v661_v6 = vmul.f32 %v2610_v3, %v659_v4 }
 0x68b   :  { %663 = vrot.lane.b32.xlu0 %v661_v6, %s2780_s15  ;;  %v770_v9 = vpop.permute.xlu1 %769 }
 0x68c   :  { %v3236_v59 = vadd.f32 %v770_v9, %v762_v46 }
 0x68e   :  { %2611 = vtanh.f32 %v3236_v59 }
 0x68f   :  { %2613 = vpow2.f32 %v2068_v12 }
 0x698   :  { %v2612_v10 = vpop.eup %2611 }
 0x699   :  { %775 = vrot.lane.b32.xlu1 %v2612_v10, %s2780_s15  ;;  %v2614_v20 = vpop.eup %2613 }
 0x69a   :  { %v756_v18 = vadd.f32 1.0, %v2614_v20 }
 0x6fd   :  { %v664_v21 = vpop.permute.xlu0 %663 }
 0x6fe   :  { %v3241_v26 = vadd.f32 %v664_v21, %v656_v13 }
 0x700   :  { %2615 = vtanh.f32 %v3241_v26 }
 0x701   :  { %2617 = vrcp.f32 %v756_v18 }
 0x702   :  { %2619 = vpow2.f32 %v2065_v57 }
 0x70a   :  { %v2616_v62 = vpop.eup %2615 }
 0x70b   :  { %669 = vrot.lane.b32.xlu0 %v2616_v62, %s2780_s15  ;;  %v2618_v19 = vpop.eup %2617  ;;  %v776_v27 = vpop.permute.xlu1 %775 }
 0x70c   :  { %v778_v28 = vmul.f32 %v2618_v19, %v776_v27  ;;  %v2620_v31 = vpop.eup %2619 }
 0x70d   :  { %v650_v35 = vadd.f32 1.0, %v2620_v31 }
 0x70e   :  { %2071 = vmatmul.mubr.msk.f32.vlgmr.msra.gmra.mrb[6].mxu0 %vm241_vm1, %v778_v28 }
 0x70f   :  { %2293 = vmatpush1.bf16.msra.mxu0 %v3011_v0  ;;  %1060 = vmatprep.mubr.f32.mxu0 %v2779_v5  ;;  %2621 = vrcp.f32 %v650_v35 }
 0x710   :  { %2295 = vmatprep.subr.bf16.mxu0 %v3013_v1 }
 0x713   :  { %2297 = vmatpush1.bf16.msra.mxu0 %v3029_v7 }
 0x714   :  { %2299 = vmatprep.subr.bf16.mxu0 %v3032_v8 }
 0x717   :  { %2301 = vmatpush1.bf16.msra.mxu0 %v3047_v15 }
 0x718   :  { %2303 = vmatprep.subr.bf16.mxu0 %v3050_v17 }
 0x719   :  { %v2622_v36 = vpop.eup %2621 }
 0x71b   :  { %2305 = vmatpush1.bf16.msra.mxu0 %v3065_v24 }
 0x71c   :  { %2307 = vmatprep.subr.bf16.mxu0 %v3068_v25 }
 0x71f   :  { %2309 = vmatpush1.bf16.msra.mxu0 %v3083_v32 }
 0x720   :  { %2311 = vmatprep.subr.bf16.mxu0 %v3086_v33 }
 0x723   :  { %2313 = vmatpush1.bf16.msra.mxu0 %v3101_v39 }
 0x724   :  { %2315 = vmatprep.subr.bf16.mxu0 %v3104_v42 }
 0x727   :  { %2317 = vmatpush1.bf16.msra.mxu0 %v3119_v51 }
 0x728   :  { %2319 = vmatprep.subr.bf16.mxu0 %v3122_v52 }
 0x72b   :  { %2321 = vmatpush1.bf16.msra.mxu0 %v3131_v56 }
 0x72c   :  { %2323 = vmatprep.subr.bf16.mxu0 %v2855_v11 }
 0x77d   :  { %v670_v37 = vpop.permute.xlu0 %669 }
 0x77e   :  { %v672_v38 = vmul.f32 %v2622_v36, %v670_v37 }
 0x780   :  { %780 = vrot.lane.b32.xlu0 %v672_v38, %s2780_s15 }
 0x7e1   :  { %v954_v44 = vpop.f32.mrb[6].mxu0 }
 0x7e2   :  { %v956_v45 = vpop.f32.mrb[7].mxu0  ;;  %v2532_v53 = vadd.f32 %v954_v44, %v2984_v49 }
 0x7e3   :  { %v3265_v40 = vadd.f32 %v956_v45, %v2974_v43 }
 0x7e4   :  { %v2072_v55 = vmul.f32 -1.442695, %v2532_v53 }
 0x7e5   :  { %2623 = vtanh.f32 %v3265_v40 }
 0x7e6   :  { %2625 = vpow2.f32 %v2072_v55 }
 0x7ef   :  { %v2624_v48 = vpop.eup %2623 }
 0x7f0   :  { %976 = vrot.lane.b32.xlu0 %v2624_v48, %s2780_s15  ;;  %v2626_v58 = vpop.eup %2625 }
 0x7f1   :  { %v967_v61 = vadd.f32 1.0, %v2626_v58 }
 0x7f2   :  { %v781_v50 = vpop.permute.xlu0 %780 }
 0x7f3   :  { %v783_v47 = vsel %vm241_vm1, %v778_v28, %v781_v50  ;;  %2627 = vrcp.f32 %v967_v61 }
 0x7f4   :  { %849 = vmatmul.mubr.f32.vlgmr.msra.gmra.mrb[4].mxu1 %v783_v47 }
 0x7f5   :  { %2341 = vmatpush1.bf16.msra.mxu1 %v3011_v0  ;;  %1272 = vmatprep.mubr.f32.mxu1 %v2779_v5 }
 0x7f6   :  { %2343 = vmatprep.subr.bf16.mxu1 %v3013_v1 }
 0x7f9   :  { %2345 = vmatpush1.bf16.msra.mxu1 %v3029_v7 }
 0x7fa   :  { %2347 = vmatprep.subr.bf16.mxu1 %v3032_v8 }
 0x7fd   :  { %2349 = vmatpush1.bf16.msra.mxu1 %v3047_v15  ;;  %v2628_v63 = vpop.eup %2627 }
 0x7fe   :  { %2351 = vmatprep.subr.bf16.mxu1 %v3050_v17  ;;  %v974_v10 = vmul.f32 %v2628_v63, %v3236_v59 }
 0x801   :  { %2353 = vmatpush1.bf16.msra.mxu1 %v3065_v24 }
 0x802   :  { %2355 = vmatprep.subr.bf16.mxu1 %v3068_v25 }
 0x805   :  { %2357 = vmatpush1.bf16.msra.mxu1 %v3083_v32 }
 0x806   :  { %2359 = vmatprep.subr.bf16.mxu1 %v3086_v33 }
 0x809   :  { %2361 = vmatpush1.bf16.msra.mxu1 %v3101_v39 }
 0x80a   :  { %2363 = vmatprep.subr.bf16.mxu1 %v3104_v42 }
 0x80d   :  { %2365 = vmatpush1.bf16.msra.mxu1 %v3119_v51 }
 0x80e   :  { %2367 = vmatprep.subr.bf16.mxu1 %v3122_v52 }
 0x811   :  { %2369 = vmatpush1.bf16.msra.mxu1 %v3131_v56 }
 0x812   :  { %2387 = vmatprep.subr.bf16.mxu1 %v3000_v60 }
 0x862   :  { %v977_v2 = vpop.permute.xlu0 %976 }
 0x863   :  { %v979_v3 = vmul.f32 %v2628_v63, %v977_v2 }
 0x865   :  { %981 = vrot.lane.b32.xlu0 %v979_v3, %s2780_s15 }
 0x8c7   :  { %v850_v4 = vpop.f32.mrb[4].mxu1 }
 0x8c8   :  { %v852_v6 = vpop.f32.mrb[5].mxu1  ;;  %v851_v21 = vadd.f32 %v850_v4, %v3183_v41 }
 0x8c9   :  { %v853_v46 = vadd.f32 %v852_v6, %v3175_v54 }
 0x8ca   :  { %v2069_v18 = vmul.f32 -1.442695, %v851_v21 }
 0x8cb   :  { %2629 = vtanh.f32 %v853_v46  ;;  %v2070_v37 = vmul.f32 -1.442695, %v853_v46 }
 0x8d5   :  { %v2630_v9 = vpop.eup %2629 }
 0x8d6   :  { %870 = vrot.lane.b32.xlu1 %v2630_v9, %s2780_s15 }
 0x8d7   :  { %v982_v12 = vpop.permute.xlu0 %981 }
 0x8d8   :  { %v3292_v13 = vadd.f32 %v982_v12, %v974_v10 }
 0x8da   :  { %2631 = vtanh.f32 %v3292_v13 }
 0x8db   :  { %2633 = vpow2.f32 %v2069_v18 }
 0x8e4   :  { %v2632_v20 = vpop.eup %2631 }
 0x8e5   :  { %987 = vrot.lane.b32.xlu0 %v2632_v20, %s2780_s15  ;;  %v2634_v62 = vpop.eup %2633 }
 0x8e6   :  { %v861_v19 = vadd.f32 1.0, %v2634_v62 }
 0x8e8   :  { %2635 = vrcp.f32 %v861_v19 }
 0x8f2   :  { %v2636_v27 = vpop.eup %2635 }
 0x8f3   :  { %v868_v59 = vmul.f32 %v2636_v27, %v3241_v26  ;;  %v2073_v26 = vmul.f32 -1.442695, %v3265_v40 }
 0x948   :  { %v871_v28 = vpop.permute.xlu1 %870 }
 0x949   :  { %v873_v57 = vmul.f32 %v2636_v27, %v871_v28 }
 0x94b   :  { %875 = vrot.lane.b32.xlu1 %v873_v57, %s2780_s15 }
 0x957   :  { %v988_v55 = vpop.permute.xlu0 %987 }
 0x9bd   :  { %v876_v31 = vpop.permute.xlu1 %875 }
 0x9be   :  { %v3299_v35 = vadd.f32 %v876_v31, %v868_v59 }
 0x9c0   :  { %2637 = vtanh.f32 %v3299_v35 }
 0x9c1   :  { %2639 = vpow2.f32 %v2070_v37 }
 0x9ca   :  { %v2638_v36 = vpop.eup %2637 }
 0x9cb   :  { %881 = vrot.lane.b32.xlu1 %v2638_v36, %s2780_s15  ;;  %v2640_v38 = vpop.eup %2639 }
 0x9cc   :  { %v862_v44 = vadd.f32 1.0, %v2640_v38 }
 0x9ce   :  { %2641 = vrcp.f32 %v862_v44 }
 0x9cf   :  { %2643 = vpow2.f32 %v2073_v26 }
 0x9d8   :  { %v2642_v45 = vpop.eup %2641 }
 0x9d9   :  { %v2644_v47 = vpop.eup %2643 }
 0x9da   :  { %v968_v53 = vadd.f32 1.0, %v2644_v47 }
 0x9dc   :  { %2645 = vrcp.f32 %v968_v53 }
 0x9e6   :  { %v2646_v58 = vpop.eup %2645 }
 0x9e7   :  { %v990_v61 = vmul.f32 %v2646_v58, %v988_v55 }
 0xa3d   :  { %v882_v48 = vpop.permute.xlu1 %881 }
 0xa3e   :  { %v884_v50 = vmul.f32 %v2642_v45, %v882_v48 }
 0xa40   :  { %992 = vrot.lane.b32.xlu1 %v884_v50, %s2780_s15 }
 0xab2   :  { %v993_v63 = vpop.permute.xlu1 %992 }
 0xab3   :  { %v995_v2 = vsel %vm241_vm1, %v990_v61, %v993_v63 }
 0xab4   :  { %1061 = vmatmul.mubr.f32.vlgmr.msra.gmra.mrb[16].mxu0 %v995_v2 }
 0xab5   :  { %2325 = vmatpush1.bf16.msra.mxu0 %v2863_v14  ;;  %1164 = vmatprep.mubr.f32.mxu0 %v2779_v5 }
 0xab6   :  { %2327 = vmatprep.subr.bf16.mxu0 %v2869_v16 }
 0xab9   :  { %2329 = vmatpush1.bf16.msra.mxu0 %v2889_v22 }
 0xaba   :  { %2331 = vmatprep.subr.bf16.mxu0 %v2892_v23 }
 0xabd   :  { %2333 = vmatpush1.bf16.msra.mxu0 %v2912_v29 }
 0xabe   :  { %2335 = vmatprep.subr.bf16.mxu0 %v2915_v30 }
 0xac1   :  { %2337 = vmatpush1.bf16.msra.mxu0 %v2929_v34 }
 0xac2   :  { %2371 = vmatprep.subr.bf16.mxu0 %v2855_v11 }
 0xac4   :  { %2076 = vmatmul.mubr.msk.f32.vlgmr.msra.gmra.mrb[8].mxu0 %vm241_vm1, %v990_v61 }
 0xac5   :  { %2373 = vmatpush1.bf16.msra.mxu0 %v2863_v14  ;;  %1376 = vmatprep.mubr.f32.mxu0 %v2779_v5 }
 0xac6   :  { %2375 = vmatprep.subr.bf16.mxu0 %v2869_v16 }
 0xac9   :  { %2377 = vmatpush1.bf16.msra.mxu0 %v2889_v22 }
 0xaca   :  { %2379 = vmatprep.subr.bf16.mxu0 %v2892_v23 }
 0xacd   :  { %2381 = vmatpush1.bf16.msra.mxu0 %v2912_v29 }
 0xace   :  { %2383 = vmatprep.subr.bf16.mxu0 %v2915_v30 }
 0xad1   :  { %2385 = vmatpush1.bf16.msra.mxu0 %v2929_v34 }
 0xad2   :  { %2419 = vmatprep.subr.bf16.mxu0 %v2855_v11 }
 0xb87   :  { %v1062_v40 = vpop.f32.mrb[16].mxu0 }
 0xb88   :  { %v1064_v3 = vpop.f32.mrb[17].mxu0  ;;  %v1063_v20 = vadd.f32 %v1062_v40, %v3183_v41 }
 0xb89   :  { %v1065_v4 = vadd.f32 %v1064_v3, %v3175_v54 }
 0xb8a   :  { %v2074_v21 = vmul.f32 -1.442695, %v1063_v20 }
 0xb8b   :  { %2647 = vtanh.f32 %v1065_v4  ;;  %v2075_v61 = vmul.f32 -1.442695, %v1065_v4 }
 0xb95   :  { %v2648_v6 = vpop.eup %2647 }
 0xb96   :  { %1082 = vrot.lane.b32.xlu0 %v2648_v6, %s2780_s15 }
 0xb97   :  { %v1166_v46 = vpop.f32.mrb[8].mxu0 }
 0xb98   :  { %v1168_v9 = vpop.f32.mrb[9].mxu0  ;;  %v2534_v18 = vadd.f32 %v1166_v46, %v2984_v49 }
 0xb99   :  { %v2535_v10 = vadd.f32 %v1168_v9, %v2974_v43 }
 0xb9a   :  { %v2077_v19 = vmul.f32 -1.442695, %v2534_v18 }
 0xb9b   :  { %2649 = vtanh.f32 %v2535_v10  ;;  %v2078_v63 = vmul.f32 -1.442695, %v2535_v10 }
 0xb9c   :  { %2651 = vpow2.f32 %v2074_v21 }
 0xb9d   :  { %2653 = vpow2.f32 %v2077_v19 }
 0xba5   :  { %v2650_v12 = vpop.eup %2649 }
 0xba6   :  { %1188 = vrot.lane.b32.xlu1 %v2650_v12, %s2780_s15  ;;  %v2652_v62 = vpop.eup %2651 }
 0xba7   :  { %v1073_v27 = vadd.f32 1.0, %v2652_v62  ;;  %v2654_v28 = vpop.eup %2653 }
 0xba8   :  { %v1179_v36 = vadd.f32 1.0, %v2654_v28 }
 0xba9   :  { %2655 = vrcp.f32 %v1073_v27 }
 0xbaa   :  { %2657 = vrcp.f32 %v1179_v36 }
 0xbb3   :  { %v2656_v57 = vpop.eup %2655 }
 0xbb4   :  { %v2658_v37 = vpop.eup %2657  ;;  %v1080_v45 = vmul.f32 %v2656_v57, %v3299_v35 }
 0xbb5   :  { %v1186_v47 = vmul.f32 %v2658_v37, %v3292_v13 }
 0xc08   :  { %v1083_v59 = vpop.permute.xlu0 %1082 }
 0xc09   :  { %v1085_v31 = vmul.f32 %v2656_v57, %v1083_v59 }
 0xc0b   :  { %1087 = vrot.lane.b32.xlu0 %v1085_v31, %s2780_s15 }
 0xc18   :  { %v1189_v38 = vpop.permute.xlu1 %1188 }
 0xc19   :  { %v1191_v44 = vmul.f32 %v2658_v37, %v1189_v38 }
 0xc1b   :  { %1193 = vrot.lane.b32.xlu1 %v1191_v44, %s2780_s15 }
 0xc7d   :  { %v1088_v48 = vpop.permute.xlu0 %1087 }
 0xc7e   :  { %v3334_v50 = vadd.f32 %v1088_v48, %v1080_v45 }
 0xc80   :  { %2659 = vtanh.f32 %v3334_v50 }
 0xc8a   :  { %v2660_v26 = vpop.eup %2659 }
 0xc8b   :  { %1093 = vrot.lane.b32.xlu0 %v2660_v26, %s2780_s15 }
 0xc8d   :  { %v1194_v53 = vpop.permute.xlu1 %1193 }
 0xc8e   :  { %v3339_v55 = vadd.f32 %v1194_v53, %v1186_v47 }
 0xc90   :  { %2661 = vtanh.f32 %v3339_v55 }
 0xc91   :  { %2663 = vpow2.f32 %v2075_v61 }
 0xc92   :  { %2665 = vpow2.f32 %v2078_v63 }
 0xc9a   :  { %v2662_v58 = vpop.eup %2661 }
 0xc9b   :  { %1199 = vrot.lane.b32.xlu1 %v2662_v58, %s2780_s15  ;;  %v2664_v35 = vpop.eup %2663 }
 0xc9c   :  { %v1074_v2 = vadd.f32 1.0, %v2664_v35  ;;  %v2666_v40 = vpop.eup %2665 }
 0xc9d   :  { %v1180_v13 = vadd.f32 1.0, %v2666_v40 }
 0xc9e   :  { %2667 = vrcp.f32 %v1074_v2 }
 0xc9f   :  { %2669 = vrcp.f32 %v1180_v13 }
 0xca8   :  { %v2668_v3 = vpop.eup %2667 }
 0xca9   :  { %v2670_v9 = vpop.eup %2669 }
 0xcfd   :  { %v1094_v6 = vpop.permute.xlu0 %1093 }
 0xcfe   :  { %v1096_v46 = vmul.f32 %v2668_v3, %v1094_v6 }
 0xd00   :  { %1204 = vrot.lane.b32.xlu0 %v1096_v46, %s2780_s15 }
 0xd0d   :  { %v1200_v12 = vpop.permute.xlu1 %1199 }
 0xd0e   :  { %v1202_v20 = vmul.f32 %v2670_v9, %v1200_v12 }
 0xd10   :  { %2081 = vmatmul.mubr.msk.f32.vlgmr.msra.gmra.mrb[10].mxu0 %vm241_vm1, %v1202_v20 }
 0xd11   :  { %2421 = vmatpush1.bf16.msra.mxu0 %v2863_v14  ;;  %1588 = vmatprep.mubr.f32.mxu0 %v2779_v5 }
 0xd12   :  { %2423 = vmatprep.subr.bf16.mxu0 %v2869_v16 }
 0xd15   :  { %2425 = vmatpush1.bf16.msra.mxu0 %v2889_v22 }
 0xd16   :  { %2427 = vmatprep.subr.bf16.mxu0 %v2892_v23 }
 0xd19   :  { %2429 = vmatpush1.bf16.msra.mxu0 %v2912_v29 }
 0xd1a   :  { %2431 = vmatprep.subr.bf16.mxu0 %v2915_v30 }
 0xd1d   :  { %2433 = vmatpush1.bf16.msra.mxu0 %v2929_v34 }
 0xd1e   :  { %2467 = vmatprep.subr.bf16.mxu0 %v2855_v11 }
 0xd72   :  { %v1205_v4 = vpop.permute.xlu0 %1204 }
 0xd73   :  { %v1207_v10 = vsel %vm241_vm1, %v1202_v20, %v1205_v4 }
 0xd74   :  { %1273 = vmatmul.mubr.f32.vlgmr.msra.gmra.mrb[6].mxu1 %v1207_v10 }
 0xd75   :  { %2389 = vmatpush1.bf16.msra.mxu1 %v3011_v0  ;;  %1484 = vmatprep.mubr.f32.mxu1 %v2779_v5 }
 0xd76   :  { %2391 = vmatprep.subr.bf16.mxu1 %v3013_v1 }
 0xd79   :  { %2393 = vmatpush1.bf16.msra.mxu1 %v3029_v7 }
 0xd7a   :  { %2395 = vmatprep.subr.bf16.mxu1 %v3032_v8 }
 0xd7d   :  { %2397 = vmatpush1.bf16.msra.mxu1 %v3047_v15 }
 0xd7e   :  { %2399 = vmatprep.subr.bf16.mxu1 %v3050_v17 }
 0xd81   :  { %2401 = vmatpush1.bf16.msra.mxu1 %v3065_v24 }
 0xd82   :  { %2403 = vmatprep.subr.bf16.mxu1 %v3068_v25 }
 0xd85   :  { %2405 = vmatpush1.bf16.msra.mxu1 %v3083_v32 }
 0xd86   :  { %2407 = vmatprep.subr.bf16.mxu1 %v3086_v33 }
 0xd89   :  { %2409 = vmatpush1.bf16.msra.mxu1 %v3101_v39 }
 0xd8a   :  { %2411 = vmatprep.subr.bf16.mxu1 %v3104_v42 }
 0xd8d   :  { %2413 = vmatpush1.bf16.msra.mxu1 %v3119_v51 }
 0xd8e   :  { %2415 = vmatprep.subr.bf16.mxu1 %v3122_v52 }
 0xd91   :  { %2417 = vmatpush1.bf16.msra.mxu1 %v3131_v56 }
 0xd92   :  { %2435 = vmatprep.subr.bf16.mxu1 %v3000_v60 }
 0xde3   :  { %v1378_v11 = vpop.f32.mrb[10].mxu0 }
 0xde4   :  { %v1380_v21 = vpop.f32.mrb[11].mxu0  ;;  %v2536_v19 = vadd.f32 %v1378_v11, %v2984_v49 }
 0xde5   :  { %v2537_v18 = vadd.f32 %v1380_v21, %v2974_v43 }
 0xde6   :  { %v2082_v27 = vmul.f32 -1.442695, %v2536_v19 }
 0xde7   :  { %2671 = vtanh.f32 %v2537_v18  ;;  %v2083_v6 = vmul.f32 -1.442695, %v2537_v18 }
 0xde8   :  { %2673 = vpow2.f32 %v2082_v27 }
 0xdf1   :  { %v2672_v62 = vpop.eup %2671 }
 0xdf2   :  { %1400 = vrot.lane.b32.xlu0 %v2672_v62, %s2780_s15  ;;  %v2674_v31 = vpop.eup %2673 }
 0xdf3   :  { %v1391_v37 = vadd.f32 1.0, %v2674_v31 }
 0xe47   :  { %v1274_v28 = vpop.f32.mrb[6].mxu1 }
 0xe48   :  { %v1276_v57 = vpop.f32.mrb[7].mxu1  ;;  %v1275_v48 = vadd.f32 %v1274_v28, %v3183_v41 }
 0xe49   :  { %v1277_v59 = vadd.f32 %v1276_v57, %v3175_v54 }
 0xe4a   :  { %v2079_v26 = vmul.f32 -1.442695, %v1275_v48 }
 0xe4b   :  { %2675 = vtanh.f32 %v1277_v59 }
 0xe4c   :  { %2677 = vrcp.f32 %v1391_v37 }
 0xe4d   :  { %2679 = vpow2.f32 %v2079_v26 }
 0xe55   :  { %v2676_v36 = vpop.eup %2675 }
 0xe56   :  { %1294 = vrot.lane.b32.xlu1 %v2676_v36, %s2780_s15  ;;  %v2678_v38 = vpop.eup %2677 }
 0xe57   :  { %v2680_v47 = vpop.eup %2679  ;;  %v1398_v63 = vmul.f32 %v2678_v38, %v3339_v55 }
 0xe58   :  { %v1285_v53 = vadd.f32 1.0, %v2680_v47 }
 0xe5a   :  { %2681 = vrcp.f32 %v1285_v53 }
 0xe64   :  { %v1401_v44 = vpop.permute.xlu0 %1400  ;;  %v2682_v58 = vpop.eup %2681 }
 0xe65   :  { %v1403_v45 = vmul.f32 %v2678_v38, %v1401_v44  ;;  %v1292_v46 = vmul.f32 %v2682_v58, %v3334_v50  ;;  %v2080_v50 = vmul.f32 -1.442695, %v1277_v59 }
 0xe67   :  { %1405 = vrot.lane.b32.xlu0 %v1403_v45, %s2780_s15 }
 0xec8   :  { %v1295_v61 = vpop.permute.xlu1 %1294 }
 0xec9   :  { %v1297_v35 = vmul.f32 %v2682_v58, %v1295_v61 }
 0xecb   :  { %1299 = vrot.lane.b32.xlu1 %v1297_v35, %s2780_s15 }
 0xed9   :  { %v1406_v2 = vpop.permute.xlu0 %1405 }
 0xeda   :  { %v3381_v40 = vadd.f32 %v1406_v2, %v1398_v63 }
 0xedc   :  { %2683 = vtanh.f32 %v3381_v40 }
 0xedd   :  { %2685 = vpow2.f32 %v2083_v6 }
 0xee6   :  { %v2684_v3 = vpop.eup %2683 }
 0xee7   :  { %1411 = vrot.lane.b32.xlu0 %v2684_v3, %s2780_s15  ;;  %v2686_v12 = vpop.eup %2685 }
 0xee8   :  { %v1392_v55 = vadd.f32 1.0, %v2686_v12 }
 0xf3d   :  { %v1300_v13 = vpop.permute.xlu1 %1299 }
 0xf3e   :  { %v3386_v9 = vadd.f32 %v1300_v13, %v1292_v46 }
 0xf40   :  { %2687 = vtanh.f32 %v3386_v9 }
 0xf41   :  { %2689 = vrcp.f32 %v1392_v55 }
 0xf42   :  { %2691 = vpow2.f32 %v2080_v50 }
 0xf4a   :  { %v2688_v20 = vpop.eup %2687 }
 0xf4b   :  { %1305 = vrot.lane.b32.xlu1 %v2688_v20, %s2780_s15  ;;  %v2690_v4 = vpop.eup %2689 }
 0xf4c   :  { %v2692_v21 = vpop.eup %2691 }
 0xf59   :  { %v1412_v10 = vpop.permute.xlu0 %1411 }
 0xf5a   :  { %v1414_v11 = vmul.f32 %v2690_v4, %v1412_v10 }
 0xf5c   :  { %2086 = vmatmul.mubr.msk.f32.vlgmr.msra.gmra.mrb[12].mxu0 %vm241_vm1, %v1414_v11 }
 0xf5d   :  { %2469 = vmatpush1.bf16.msra.mxu0 %v2863_v14  ;;  %1800 = vmatprep.mubr.f32.mxu0 %v2779_v5  ;;  %v1286_v14 = vadd.f32 1.0, %v2692_v21 }
 0xf5e   :  { %2471 = vmatprep.subr.bf16.mxu0 %v2869_v16 }
 0xf5f   :  { %2693 = vrcp.f32 %v1286_v14 }
 0xf61   :  { %2473 = vmatpush1.bf16.msra.mxu0 %v2889_v22 }
 0xf62   :  { %2475 = vmatprep.subr.bf16.mxu0 %v2892_v23 }
 0xf65   :  { %2477 = vmatpush1.bf16.msra.mxu0 %v2912_v29 }
 0xf66   :  { %2479 = vmatprep.subr.bf16.mxu0 %v2915_v30 }
 0xf69   :  { %2481 = vmatpush1.bf16.msra.mxu0 %v2929_v34  ;;  %v2694_v18 = vpop.eup %2693 }
 0xf6a   :  { %2483 = vmatprep.subr.bf16.mxu0 %v3000_v60 }
 0xfbd   :  { %v1306_v62 = vpop.permute.xlu1 %1305 }
 0xfbe   :  { %v1308_v16 = vmul.f32 %v2694_v18, %v1306_v62 }
 0xfc0   :  { %1416 = vrot.lane.b32.xlu1 %v1308_v16, %s2780_s15 }
0x102f   :  { %v1590_v22 = vpop.f32.mrb[12].mxu0 }
0x1030   :  { %v1592_v23 = vpop.f32.mrb[13].mxu0  ;;  %v2538_v60 = vadd.f32 %v1590_v22, %v2984_v49 }
0x1031   :  { %v2539_v29 = vadd.f32 %v1592_v23, %v2974_v43 }
0x1032   :  { %v1417_v19 = vpop.permute.xlu1 %1416  ;;  %v2087_v27 = vmul.f32 -1.442695, %v2538_v60 }
0x1033   :  { %2695 = vtanh.f32 %v2539_v29  ;;  %v1419_v30 = vsel %vm241_vm1, %v1414_v11, %v1417_v19  ;;  %v2088_v2 = vmul.f32 -1.442695, %v2539_v29 }
0x1034   :  { %1485 = vmatmul.mubr.f32.vlgmr.msra.gmra.mrb[8].mxu1 %v1419_v30  ;;  %2697 = vpow2.f32 %v2087_v27 }
0x1035   :  { %2437 = vmatpush1.bf16.msra.mxu1 %v3011_v0  ;;  %1696 = vmatprep.mubr.f32.mxu1 %v2779_v5 }
0x1036   :  { %2439 = vmatprep.subr.bf16.mxu1 %v3013_v1 }
0x1039   :  { %2441 = vmatpush1.bf16.msra.mxu1 %v3029_v7 }
0x103a   :  { %2443 = vmatprep.subr.bf16.mxu1 %v3032_v8 }
0x103d   :  { %v2696_v34 = vpop.eup %2695  ;;  %2445 = vmatpush1.bf16.msra.mxu1 %v3047_v15 }
0x103e   :  { %1612 = vrot.lane.b32.xlu1 %v2696_v34, %s2780_s15  ;;  %2447 = vmatprep.subr.bf16.mxu1 %v3050_v17  ;;  %v2698_v28 = vpop.eup %2697 }
0x103f   :  { %v1603_v57 = vadd.f32 1.0, %v2698_v28 }
0x1041   :  { %2449 = vmatpush1.bf16.msra.mxu1 %v3065_v24  ;;  %2699 = vrcp.f32 %v1603_v57 }
0x1042   :  { %2451 = vmatprep.subr.bf16.mxu1 %v3068_v25 }
0x1045   :  { %2453 = vmatpush1.bf16.msra.mxu1 %v3083_v32 }
0x1046   :  { %2455 = vmatprep.subr.bf16.mxu1 %v3086_v33 }
0x1049   :  { %2457 = vmatpush1.bf16.msra.mxu1 %v3101_v39 }
0x104a   :  { %2459 = vmatprep.subr.bf16.mxu1 %v3104_v42 }
0x104b   :  { %v2700_v59 = vpop.eup %2699 }
0x104c   :  { %v1610_v48 = vmul.f32 %v2700_v59, %v3381_v40 }
0x104d   :  { %2461 = vmatpush1.bf16.msra.mxu1 %v3119_v51 }
0x104e   :  { %2463 = vmatprep.subr.bf16.mxu1 %v3122_v52 }
0x1051   :  { %2465 = vmatpush1.bf16.msra.mxu1 %v3131_v56 }
0x10b0   :  { %v1613_v31 = vpop.permute.xlu1 %1612 }
0x10b1   :  { %v1615_v36 = vmul.f32 %v2700_v59, %v1613_v31 }
0x10b3   :  { %1617 = vrot.lane.b32.xlu1 %v1615_v36, %s2780_s15 }
0x1107   :  { %v1486_v37 = vpop.f32.mrb[8].mxu1 }
0x1108   :  { %v1488_v38 = vpop.f32.mrb[9].mxu1  ;;  %v1487_v58 = vadd.f32 %v1486_v37, %v3183_v41 }
0x1109   :  { %v1489_v44 = vadd.f32 %v1488_v38, %v3175_v54 }
0x110a   :  { %v2084_v61 = vmul.f32 -1.442695, %v1487_v58 }
0x110b   :  { %2701 = vtanh.f32 %v1489_v44 }
0x1115   :  { %v2702_v45 = vpop.eup %2701 }
0x1116   :  { %1506 = vrot.lane.b32.xlu0 %v2702_v45, %s2780_s15 }
0x1125   :  { %v1618_v26 = vpop.permute.xlu1 %1617 }
0x1126   :  { %v3425_v47 = vadd.f32 %v1618_v26, %v1610_v48 }
0x1128   :  { %2703 = vtanh.f32 %v3425_v47 }
0x1129   :  { %2705 = vpow2.f32 %v2084_v61 }
0x1132   :  { %v2704_v53 = vpop.eup %2703 }
0x1133   :  { %1623 = vrot.lane.b32.xlu1 %v2704_v53, %s2780_s15  ;;  %v2706_v35 = vpop.eup %2705 }
0x1134   :  { %v1497_v63 = vadd.f32 1.0, %v2706_v35 }
0x1136   :  { %2707 = vrcp.f32 %v1497_v63 }
0x1137   :  { %2709 = vpow2.f32 %v2088_v2 }
0x1140   :  { %v2708_v3 = vpop.eup %2707 }
0x1141   :  { %v2710_v40 = vpop.eup %2709 }
0x1142   :  { %v1604_v13 = vadd.f32 1.0, %v2710_v40 }
0x1144   :  { %2711 = vrcp.f32 %v1604_v13 }
0x114e   :  { %v2712_v12 = vpop.eup %2711 }
0x1188   :  { %v1507_v6 = vpop.permute.xlu0 %1506 }
0x1189   :  { %v1509_v46 = vmul.f32 %v2708_v3, %v1507_v6 }
0x118b   :  { %1511 = vrot.lane.b32.xlu0 %v1509_v46, %s2780_s15 }
0x11a5   :  { %v1624_v20 = vpop.permute.xlu1 %1623 }
0x11a6   :  { %v1626_v55 = vmul.f32 %v2712_v12, %v1624_v20 }
0x11a8   :  { %2091 = vmatmul.mubr.msk.f32.vlgmr.msra.gmra.mrb[14].mxu0 %vm241_vm1, %v1626_v55 }
0x11a9   :  { %2485 = vmatpush1.bf16.msra.mxu0 %v3011_v0  ;;  %1908 = vmatprep.mubr.f32.mxu0 %v2779_v5  ;;  %v1504_v0 = vmul.f32 %v2708_v3, %v3386_v9 }
0x11aa   :  { %2487 = vmatprep.subr.bf16.mxu0 %v3013_v1 }
0x11ad   :  { %2489 = vmatpush1.bf16.msra.mxu0 %v3029_v7 }
0x11ae   :  { %2491 = vmatprep.subr.bf16.mxu0 %v3032_v8 }
0x11b1   :  { %2493 = vmatpush1.bf16.msra.mxu0 %v3047_v15  ;;  %v2085_v15 = vmul.f32 -1.442695, %v1489_v44 }
0x11b2   :  { %2495 = vmatprep.subr.bf16.mxu0 %v3050_v17 }
0x11b5   :  { %2497 = vmatpush1.bf16.msra.mxu0 %v3065_v24 }
0x11b6   :  { %2499 = vmatprep.subr.bf16.mxu0 %v3068_v25 }
0x11b9   :  { %2501 = vmatpush1.bf16.msra.mxu0 %v3083_v32 }
0x11ba   :  { %2503 = vmatprep.subr.bf16.mxu0 %v3086_v33 }
0x11bd   :  { %2505 = vmatpush1.bf16.msra.mxu0 %v3101_v39 }
0x11be   :  { %2507 = vmatprep.subr.bf16.mxu0 %v3104_v42 }
0x11c1   :  { %2509 = vmatpush1.bf16.msra.mxu0 %v3119_v51 }
0x11c2   :  { %2511 = vmatprep.subr.bf16.mxu0 %v3122_v52 }
0x11c5   :  { %2513 = vmatpush1.bf16.msra.mxu0 %v3131_v56 }
0x11fd   :  { %v1512_v1 = vpop.permute.xlu0 %1511 }
0x11fe   :  { %v1514_v7 = vadd.f32 %v1512_v1, %v1504_v0 }
0x1200   :  { %2713 = vtanh.f32 %v1514_v7 }
0x1201   :  { %2715 = vpow2.f32 %v2085_v15 }
0x120a   :  { %v2714_v8 = vpop.eup %2713 }
0x120b   :  { %1517 = vrot.lane.b32.xlu0 %v2714_v8, %s2780_s15  ;;  %v2716_v17 = vpop.eup %2715 }
0x120c   :  { %v1498_v24 = vadd.f32 1.0, %v2716_v17 }
0x120e   :  { %2717 = vrcp.f32 %v1498_v24  ;;  %v1946_v24 = vld [vmem:[%s3517_s6 + $0x8] sm:$0xff] }
0x1218   :  { %v2718_v33 = vpop.eup %2717 }
0x127b   :  { %v1802_v25 = vpop.f32.mrb[14].mxu0 }
0x127c   :  { %v1804_v32 = vpop.f32.mrb[15].mxu0  ;;  %v2540_v56 = vadd.f32 %v1802_v25, %v2984_v49  ;;  %v2781_v25 = vmov 0.0|0.0  }
0x127d   :  { %v2541_v39 = vadd.f32 %v1804_v32, %v2974_v43  ;;  %v1518_v42 = vpop.permute.xlu0 %1517  ;;  %2514 = vmatprep.subr.bf16.mxu1 %v2781_v25 }
0x127e   :  { %v1520_v51 = vmul.f32 %v2718_v33, %v1518_v42  ;;  %v2092_v9 = vmul.f32 -1.442695, %v2540_v56  ;;  %v1948_v33 = vld [vmem:[%s3517_s6 + $0x18] sm:$0xff]  ;;  %v1949_v42 = vld [vmem:[%s3517_s6 + $0x20] sm:$0xff]  ;;  %v1951_v56 = vld [vmem:[%s3517_s6 + $0x30] sm:$0xff] }
0x127f   :  { %2719 = vtanh.f32 %v2541_v39  ;;  %v2093_v58 = vmul.f32 -1.442695, %v2541_v39 }
0x1280   :  { %1628 = vrot.lane.b32.xlu0 %v1520_v51, %s2780_s15  ;;  %2721 = vpow2.f32 %v2092_v9  ;;  %v1950_v51 = vld [vmem:[%s3517_s6 + $0x28] sm:$0xff]  ;;  %v1952_v9 = vld [vmem:[%s3517_s6 + $0x38] sm:$0xff] }
0x1289   :  { %v2720_v52 = vpop.eup %2719 }
0x128a   :  { %1824 = vrot.lane.b32.xlu0 %v2720_v52, %s2780_s15  ;;  %v2722_v4 = vpop.eup %2721  ;;  %v2521_v52 = vpack.c.bf16 %v1950_v51, %v1949_v42 }
0x128b   :  { %v1815_v10 = vadd.f32 1.0, %v2722_v4  ;;  %v2524_v4 = vpack.c.bf16 %v1952_v9, %v1951_v56 }
0x128d   :  { %2723 = vrcp.f32 %v1815_v10 }
0x1297   :  { %v2724_v43 = vpop.eup %2723 }
0x1298   :  { %v1822_v18 = vmul.f32 %v2724_v43, %v3425_v47 }
0x12f2   :  { %v1629_v11 = vpop.permute.xlu0 %1628 }
0x12f3   :  { %v1631_v50 = vsel %vm241_vm1, %v1626_v55, %v1629_v11 }
0x12f4   :  { %1697 = vmatmul.mubr.f32.vlgmr.msra.gmra.mrb[10].mxu1 %v1631_v50 }
0x12f5   :  { %2123 = vmatprep.mubr.msk.f32.mxu1 %vm2782_vm2, %v2779_v5 }
0x12fc   :  { %v1825_v21 = vpop.permute.xlu0 %1824 }
0x12fd   :  { %v1827_v14 = vmul.f32 %v2724_v43, %v1825_v21 }
0x12ff   :  { %1829 = vrot.lane.b32.xlu0 %v1827_v14, %s2780_s15 }
0x1371   :  { %v1830_v62 = vpop.permute.xlu0 %1829 }
0x1372   :  { %v1832_v16 = vadd.f32 %v1830_v62, %v1822_v18 }
0x1374   :  { %2725 = vtanh.f32 %v1832_v16 }
0x137e   :  { %v2726_v49 = vpop.eup %2725 }
0x137f   :  { %1835 = vrot.lane.b32.xlu0 %v2726_v49, %s2780_s15 }
0x13c7   :  { %v1698_v22 = vpop.f32.mrb[10].mxu1 }
0x13c8   :  { %v1700_v23 = vpop.f32.mrb[11].mxu1  ;;  %v1699_v30 = vadd.f32 %v1698_v22, %v3183_v41  ;;  %v2096_v22 = vld [vmem:[%s3518_s7] ss:$0 sm:$0xff] }
0x13c9   :  { %v1701_v29 = vadd.f32 %v1700_v23, %v3175_v54 }
0x13ca   :  { %v2089_v34 = vmul.f32 -1.442695, %v1699_v30 }
0x13cb   :  { %2727 = vtanh.f32 %v1701_v29  ;;  %v2090_v44 = vmul.f32 -1.442695, %v1701_v29 }
0x13cc   :  { %2729 = vpow2.f32 %v2089_v34 }
0x13d5   :  { %v2728_v19 = vpop.eup %2727 }
0x13d6   :  { %1718 = vrot.lane.b32.xlu1 %v2728_v19, %s2780_s15  ;;  %v2730_v60 = vpop.eup %2729 }
0x13d7   :  { %v1709_v27 = vadd.f32 1.0, %v2730_v60 }
0x13d9   :  { %2731 = vrcp.f32 %v1709_v27 }
0x13e3   :  { %v2732_v28 = vpop.eup %2731 }
0x13e4   :  { %v1716_v31 = vmul.f32 %v2732_v28, %v1514_v7 }
0x13f1   :  { %v1836_v63 = vpop.permute.xlu0 %1835 }
0x1448   :  { %v1719_v57 = vpop.permute.xlu1 %1718 }
0x1449   :  { %v1721_v59 = vmul.f32 %v2732_v28, %v1719_v57 }
0x144b   :  { %1723 = vrot.lane.b32.xlu1 %v1721_v59, %s2780_s15 }
0x14bd   :  { %v1724_v36 = vpop.permute.xlu1 %1723 }
0x14be   :  { %v1726_v37 = vadd.f32 %v1724_v36, %v1716_v31 }
0x14c0   :  { %2733 = vtanh.f32 %v1726_v37 }
0x14c1   :  { %2735 = vpow2.f32 %v2090_v44 }
0x14ca   :  { %v2734_v38 = vpop.eup %2733 }
0x14cb   :  { %1729 = vrot.lane.b32.xlu1 %v2734_v38, %s2780_s15  ;;  %v2736_v45 = vpop.eup %2735 }
0x14cc   :  { %v1710_v48 = vadd.f32 1.0, %v2736_v45 }
0x14ce   :  { %2737 = vrcp.f32 %v1710_v48 }
0x14cf   :  { %2739 = vpow2.f32 %v2093_v58 }
0x14d8   :  { %v2738_v26 = vpop.eup %2737 }
0x14d9   :  { %v2740_v61 = vpop.eup %2739 }
0x14da   :  { %v1816_v35 = vadd.f32 1.0, %v2740_v61 }
0x14dc   :  { %2741 = vrcp.f32 %v1816_v35 }
0x14e6   :  { %v2742_v2 = vpop.eup %2741 }
0x14e7   :  { %v1838_v3 = vmul.f32 %v2742_v2, %v1836_v63 }
0x153d   :  { %v1730_v47 = vpop.permute.xlu1 %1729 }
0x153e   :  { %v1732_v53 = vmul.f32 %v2738_v26, %v1730_v47 }
0x1540   :  { %1840 = vrot.lane.b32.xlu1 %v1732_v53, %s2780_s15 }
0x15b2   :  { %v1841_v6 = vpop.permute.xlu1 %1840 }
0x15b3   :  { %v1843_v46 = vsel %vm241_vm1, %v1838_v3, %v1841_v6 }
0x15b4   :  { %1909 = vmatmul.mubr.f32.vlgmr.msra.gmra.mrb[18].mxu0 %v1843_v46 }
0x1687   :  { %v1910_v40 = vpop.f32.mrb[18].mxu0 }
0x1688   :  { %v1912_v13 = vpop.f32.mrb[19].mxu0  ;;  %v1911_v55 = vadd.f32 %v1910_v40, %v3183_v41  ;;  %v1947_v41 = vld [vmem:[%s3517_s6 + $0x10] sm:$0xff] }
0x1689   :  { %v1913_v12 = vadd.f32 %v1912_v13, %v3175_v54  ;;  %v1945_v54 = vld [vmem:[%s3517_s6] sm:$0xff]  ;;  %v2518_v39 = vpack.c.bf16 %v1948_v33, %v1947_v41 }
0x168a   :  { %v2094_v0 = vmul.f32 -1.442695, %v1911_v55  ;;  %v2515_v32 = vpack.c.bf16 %v1946_v24, %v1945_v54 }
0x168b   :  { %2743 = vtanh.f32 %v1913_v12  ;;  %v2095_v21 = vmul.f32 -1.442695, %v1913_v12 }
0x168c   :  { %2745 = vpow2.f32 %v2094_v0  ;;  %2516 = vmatpush3.bf16.msra.mxu1 %v2515_v32 }
0x168d   :  { %2517 = vmatprep.subr.bf16.mxu1 %v2781_v25 }
0x1690   :  { %2519 = vmatpush3.bf16.msra.mxu1 %v2518_v39 }
0x1691   :  { %2520 = vmatprep.subr.bf16.mxu1 %v2781_v25 }
0x1694   :  { %2522 = vmatpush3.bf16.msra.mxu1 %v2521_v52 }
0x1695   :  { %v2744_v20 = vpop.eup %2743  ;;  %2523 = vmatprep.subr.bf16.mxu1 %v2781_v25 }
0x1696   :  { %1930 = vrot.lane.b32.xlu0 %v2744_v20, %s2780_s15  ;;  %v2746_v1 = vpop.eup %2745 }
0x1697   :  { %v1921_v7 = vadd.f32 1.0, %v2746_v1 }
0x1698   :  { %2525 = vmatpush3.bf16.msra.mxu1 %v2524_v4 }
0x1699   :  { %2747 = vrcp.f32 %v1921_v7 }
0x16a3   :  { %v2748_v8 = vpop.eup %2747 }
0x16a4   :  { %v1928_v10 = vmul.f32 %v2748_v8, %v1726_v37 }
0x1708   :  { %v1931_v15 = vpop.permute.xlu0 %1930 }
0x1709   :  { %v1933_v17 = vmul.f32 %v2748_v8, %v1931_v15 }
0x170b   :  { %1935 = vrot.lane.b32.xlu1 %v1933_v17, %s2780_s15 }
0x177d   :  { %v1936_v11 = vpop.permute.xlu1 %1935 }
0x177e   :  { %v1938_v50 = vadd.f32 %v1936_v11, %v1928_v10 }
0x1780   :  { %2749 = vtanh.f32 %v1938_v50 }
0x1781   :  { %2751 = vpow2.f32 %v2095_v21 }
0x178a   :  { %v2750_v43 = vpop.eup %2749 }
0x178b   :  { %1941 = vrot.lane.b32.xlu0 %v2750_v43, %s2780_s15  ;;  %v2752_v14 = vpop.eup %2751  ;;  %s2755_s15 = scalar_lea.vmem %s2041_s21, 128 }
0x178c   :  { %v1922_v18 = vadd.f32 1.0, %v2752_v14  ;;  %p2756_p0 = scmp.ne.s32.totalorder %s2041_s21, %s2755_s15  ;;  %p2761_p2 = scmp.lt.s32.totalorder %s2755_s15, %s2755_s15 }
0x178e   :  { %2753 = vrcp.f32 %v1922_v18  ;;  %p2762_p3 = por %p2761_p2, %p2760_p1 }
0x1790   :  { %p2763_p4 = pnand %p2762_p3, %p2756_p0 }
0x1798   :  { %v2754_v62 = vpop.eup %2753 }
0x17fd   :  { %v1942_v16 = vpop.permute.xlu0 %1941 }
0x17fe   :  { %v1944_v49 = vmul.f32 %v2754_v62, %v1942_v16 }
0x1800   :  { %2124 = vmatmul.mubr.msk.f32.vlgmr.msra.gmra.mrb[12].mxu1 %vm241_vm1, %v1944_v49 }
0x18d3   :  { %v2029_v5 = vpop.f32.mrb[12].mxu1 }
0x18d4   :  { %v2030_v23 = vadd.f32 %v2096_v22, %v2029_v5  ;;  %v2125_v29 = vpop.f32.mrb[13].mxu1 }
0x18d6   :  { %2033 = vst [vmem:[#allocation2] sm:$0xff] %v2030_v23 }
0x18d7   :  { %2766 = shalt.err (!%p2763_p4)
}
0x18d8   :  { %s2767_s24 = scalar_lea.hbm %s3519_s8, 128 }
0x18d9   :  { %p2768_p5 = scmp.ne.s32.totalorder %s3519_s8, %s2767_s24  ;;  %p2771_p6 = scmp.lt.u32.totalorder %s2767_s24, %s3519_s8 }
0x18db   :  { %p2773_p7 = pnand %p2771_p6, %p2768_p5 }
0x18dd   :  { %2776 = shalt.err (!%p2773_p7)
}
0x18de   :  { %2043 = dma.vmem_to_hbm [thread:$0]  %s2041_s21, 128, %s3519_s8, [#allocation3]  }
0x18df   :  { %2777 = dma.done.wait [#allocation3], 128  }
0x18e0   :  { %2778 = vsyncadd [#allocation3], 4294967168 }
0x18e1   :  { %2047 = vsyncpa [#allocation3], 1 }

</bundles_post_ra>
